<compile_context>
chip_gen: v7x
topology: tpu7x:2x2x1
jax: 0.10.0
libtpu: 0.0.40
codegen_flags: <defaults>
</compile_context>

<pallas_src>
import jax
import jax.numpy as jnp
from jax.experimental import pallas as pl
from jax.experimental.pallas import tpu as pltpu

IM_DIM = 784
PAD_IM_DIM = 896  # 7 * 128, lane-aligned K for the first (largest) matmul


def _leaky_relu(x, slope=0.2):
    return jnp.where(x > 0, x, slope * x)


def disc_kernel(x_ref,
                w1_ref, b1_ref,
                w2_ref, b2_ref,
                w3_ref, b3_ref,
                w4_ref, b4_ref,
                o_ref):
    # x tile: (TILE_B, 896) f32 ; w1/w2/w3: bf16 (in, out) ; biases: f32 (1, out)
    # w4_ref: (1, 128) f32 weight row for the final layer ; b4_ref: (1, 1) f32.
    x = x_ref[...].astype(jnp.bfloat16)

    h1 = jnp.dot(x, w1_ref[...], preferred_element_type=jnp.float32) + b1_ref[...]
    h1 = _leaky_relu(h1)

    h2 = jnp.dot(h1.astype(jnp.bfloat16), w2_ref[...],
                 preferred_element_type=jnp.float32) + b2_ref[...]
    h2 = _leaky_relu(h2)

    h3 = jnp.dot(h2.astype(jnp.bfloat16), w3_ref[...],
                 preferred_element_type=jnp.float32) + b3_ref[...]
    h3 = _leaky_relu(h3)

    # Final 128 -> 1 layer as a lane reduction (f32 on the VPU/XLU).
    logit = jnp.sum(h3 * w4_ref[...], axis=-1, keepdims=True) + b4_ref[...]
    o_ref[...] = jax.nn.sigmoid(logit)


def discriminator_forward(x, params, *, tile_b=256):
    """x: (B, 784) float32; params: list of (W, b) with W (in, out), b (1, out)."""
    (w1, b1), (w2, b2), (w3, b3), (w4, b4) = params
    B, im_dim = x.shape
    assert im_dim == IM_DIM

    # --- host-side prep -----------------------------------------------------
    # Zero-pad the feature/K axis 784 -> 896 (padding contributes 0 to the dot).
    x_p = jnp.pad(x, ((0, 0), (0, PAD_IM_DIM - IM_DIM)))
    w1_p = jnp.pad(w1, ((0, PAD_IM_DIM - IM_DIM), (0, 0)))

    # bf16 weights for the MXU matmuls; keep final-layer row + biases f32.
    w1_bf = w1_p.astype(jnp.bfloat16)
    w2_bf = w2.astype(jnp.bfloat16)
    w3_bf = w3.astype(jnp.bfloat16)
    w4_row = w4.T.astype(jnp.float32)            # (1, 128)

    # Batch tiling: tile_b multiple of 8, pad batch up to a whole number of tiles.
    tile_b = max(8, (min(tile_b, max(B, 8)) // 8) * 8)
    n_tiles = pl.cdiv(B, tile_b)
    b_pad = n_tiles * tile_b
    if b_pad != B:
        x_p = jnp.pad(x_p, ((0, b_pad - B), (0, 0)))

    # --- specs ---------------------------------------------------------------
    x_spec = pl.BlockSpec((tile_b, PAD_IM_DIM), lambda i: (i, 0))
    out_spec = pl.BlockSpec((tile_b, 1), lambda i: (i, 0))

    def resident(arr):
        # Same block every grid step -> stays VMEM-resident, no re-DMA.
        return pl.BlockSpec(arr.shape, lambda i: (0, 0))

    in_specs = [
        x_spec,
        resident(w1_bf), resident(b1),
        resident(w2_bf), resident(b2),
        resident(w3_bf), resident(b3),
        resident(w4_row), resident(b4),
    ]

    flops = 2 * b_pad * (PAD_IM_DIM * 512 + 512 * 256 + 256 * 128 + 128 * 1)
    bytes_accessed = (
        x_p.size * 4 + b_pad * 1 * 4
        + (w1_bf.size + w2_bf.size + w3_bf.size) * 2
        + (w4_row.size + b1.size + b2.size + b3.size + b4.size) * 4
    )
    cost = pl.CostEstimate(flops=flops, transcendentals=b_pad,
                           bytes_accessed=bytes_accessed)

    out = pl.pallas_call(
        disc_kernel,
        out_shape=jax.ShapeDtypeStruct((b_pad, 1), jnp.float32),
        grid=(n_tiles,),
        in_specs=in_specs,
        out_specs=out_spec,
        compiler_params=pltpu.CompilerParams(
            dimension_semantics=("parallel",),
        ),
        cost_estimate=cost,
    )(x_p, w1_bf, b1, w2_bf, b2, w3_bf, b3, w4_row, b4)

    return out[:B]


def init_linear(key, in_dim, out_dim):
    # PyTorch nn.Linear default init: U(-1/sqrt(in), 1/sqrt(in)) for W and b.
    kw, kb = jax.random.split(key)
    bound = 1.0 / jnp.sqrt(jnp.float32(in_dim))
    # Stored transposed relative to PyTorch: (in, out).
    w = jax.random.uniform(kw, (in_dim, out_dim), jnp.float32, -bound, bound)
    b = jax.random.uniform(kb, (1, out_dim), jnp.float32, -bound, bound)
    return w, b


def reference_forward(x, params):
    # Mirrors the kernel's numerics: bf16 matmul operands, f32 accumulation,
    # f32 bias / LeakyReLU / sigmoid, final layer in f32.
    (w1, b1), (w2, b2), (w3, b3), (w4, b4) = params
    h = x
    for w, b in ((w1, b1), (w2, b2), (w3, b3)):
        h = jnp.dot(h.astype(jnp.bfloat16), w.astype(jnp.bfloat16),
                    preferred_element_type=jnp.float32) + b
        h = jnp.where(h > 0, h, 0.2 * h)
    logit = h @ w4 + b4
    return jax.nn.sigmoid(logit)


if __name__ == "__main__":
    im_dim, hidden_dim = 784, 128
    dims = [im_dim, hidden_dim * 4, hidden_dim * 2, hidden_dim, 1]
    batch = 8

    key = jax.random.PRNGKey(0)
    keys = jax.random.split(key, len(dims))  # last key used for input
    params = [init_linear(keys[i], dims[i], dims[i + 1]) for i in range(len(dims) - 1)]
    x = jax.random.normal(keys[-1], (batch, im_dim), jnp.float32)

    out = discriminator_forward(x, params)
    out = jax.block_until_ready(out)

    ref = reference_forward(x, params)
    assert out.shape == (batch, 1)
    assert jnp.allclose(out, ref, atol=2e-3, rtol=2e-3), "mismatch vs JAX reference"

    print("KERNEL_OK")
</pallas_src>

<mosaic_0001>
module attributes {stable_mosaic.version = 11 : i64} {
  func.func @disc_kernel(%arg0: i32, %arg1: memref<8x896xf32, #tpu.memory_space<vmem>>, %arg2: memref<896x512xbf16, #tpu.memory_space<vmem>>, %arg3: memref<1x512xf32, #tpu.memory_space<vmem>>, %arg4: memref<512x256xbf16, #tpu.memory_space<vmem>>, %arg5: memref<1x256xf32, #tpu.memory_space<vmem>>, %arg6: memref<256x128xbf16, #tpu.memory_space<vmem>>, %arg7: memref<1x128xf32, #tpu.memory_space<vmem>>, %arg8: memref<1x128xf32, #tpu.memory_space<vmem>>, %arg9: memref<1x1xf32, #tpu.memory_space<vmem>>, %arg10: memref<8x1xf32, #tpu.memory_space<vmem>>) attributes {dimension_semantics = [#tpu.dimension_semantics<parallel>], iteration_bounds = array<i64: 1>, scalar_prefetch = 0 : i64, scratch_operands = 0 : i64, tpu.core_type = #tpu.core_type<tc>, window_params = [{transform_indices = @transform_0, window_bounds = array<i64: 8, 896>}, {pipeline_mode = #tpu.pipeline_mode<synchronous>, transform_indices = @transform_1, window_bounds = array<i64: 896, 512>}, {pipeline_mode = #tpu.pipeline_mode<synchronous>, transform_indices = @transform_2, window_bounds = array<i64: 1, 512>}, {pipeline_mode = #tpu.pipeline_mode<synchronous>, transform_indices = @transform_3, window_bounds = array<i64: 512, 256>}, {pipeline_mode = #tpu.pipeline_mode<synchronous>, transform_indices = @transform_4, window_bounds = array<i64: 1, 256>}, {pipeline_mode = #tpu.pipeline_mode<synchronous>, transform_indices = @transform_5, window_bounds = array<i64: 256, 128>}, {pipeline_mode = #tpu.pipeline_mode<synchronous>, transform_indices = @transform_6, window_bounds = array<i64: 1, 128>}, {pipeline_mode = #tpu.pipeline_mode<synchronous>, transform_indices = @transform_7, window_bounds = array<i64: 1, 128>}, {pipeline_mode = #tpu.pipeline_mode<synchronous>, transform_indices = @transform_8, window_bounds = array<i64: 1, 1>}, {transform_indices = @transform_9, window_bounds = array<i64: 8, 1>}]} {
    %c0 = arith.constant 0 : index
    %c0_0 = arith.constant 0 : index
    %0 = vector.load %arg1[%c0, %c0_0] : memref<8x896xf32, #tpu.memory_space<vmem>>, vector<8x896xf32>
    %1 = arith.truncf %0 : vector<8x896xf32> to vector<8x896xbf16>
    %c0_1 = arith.constant 0 : index
    %c0_2 = arith.constant 0 : index
    %2 = vector.load %arg2[%c0_1, %c0_2] : memref<896x512xbf16, #tpu.memory_space<vmem>>, vector<896x512xbf16>
    %cst = arith.constant dense<0.000000e+00> : vector<8x512xf32>
    %3 = tpu.matmul %1, %2, %cst {dimension_numbers = #tpu.dot_dimension_numbers<[1], [0], [0], [1], [0, 0, 1, 1], [], []>} : vector<8x896xbf16>, vector<896x512xbf16>, vector<8x512xf32> -> vector<8x512xf32>
    %c0_3 = arith.constant 0 : index
    %c0_4 = arith.constant 0 : index
    %4 = vector.load %arg3[%c0_3, %c0_4] : memref<1x512xf32, #tpu.memory_space<vmem>>, vector<1x512xf32>
    %5 = vector.broadcast %4 : vector<1x512xf32> to vector<8x512xf32>
    %6 = arith.addf %3, %5 : vector<8x512xf32>
    %cst_5 = arith.constant 0.000000e+00 : f32
    %7 = vector.broadcast %cst_5 : f32 to vector<8x512xf32>
    %8 = arith.cmpf ogt, %6, %7 : vector<8x512xf32>
    %cst_6 = arith.constant 2.000000e-01 : f32
    %9 = vector.broadcast %cst_6 : f32 to vector<8x512xf32>
    %10 = arith.mulf %9, %6 : vector<8x512xf32>
    %11 = arith.select %8, %6, %10 : vector<8x512xi1>, vector<8x512xf32>
    %12 = arith.truncf %11 : vector<8x512xf32> to vector<8x512xbf16>
    %c0_7 = arith.constant 0 : index
    %c0_8 = arith.constant 0 : index
    %13 = vector.load %arg4[%c0_7, %c0_8] : memref<512x256xbf16, #tpu.memory_space<vmem>>, vector<512x256xbf16>
    %cst_9 = arith.constant dense<0.000000e+00> : vector<8x256xf32>
    %14 = tpu.matmul %12, %13, %cst_9 {dimension_numbers = #tpu.dot_dimension_numbers<[1], [0], [0], [1], [0, 0, 1, 1], [], []>} : vector<8x512xbf16>, vector<512x256xbf16>, vector<8x256xf32> -> vector<8x256xf32>
    %c0_10 = arith.constant 0 : index
    %c0_11 = arith.constant 0 : index
    %15 = vector.load %arg5[%c0_10, %c0_11] : memref<1x256xf32, #tpu.memory_space<vmem>>, vector<1x256xf32>
    %16 = vector.broadcast %15 : vector<1x256xf32> to vector<8x256xf32>
    %17 = arith.addf %14, %16 : vector<8x256xf32>
    %cst_12 = arith.constant 0.000000e+00 : f32
    %18 = vector.broadcast %cst_12 : f32 to vector<8x256xf32>
    %19 = arith.cmpf ogt, %17, %18 : vector<8x256xf32>
    %cst_13 = arith.constant 2.000000e-01 : f32
    %20 = vector.broadcast %cst_13 : f32 to vector<8x256xf32>
    %21 = arith.mulf %20, %17 : vector<8x256xf32>
    %22 = arith.select %19, %17, %21 : vector<8x256xi1>, vector<8x256xf32>
    %23 = arith.truncf %22 : vector<8x256xf32> to vector<8x256xbf16>
    %c0_14 = arith.constant 0 : index
    %c0_15 = arith.constant 0 : index
    %24 = vector.load %arg6[%c0_14, %c0_15] : memref<256x128xbf16, #tpu.memory_space<vmem>>, vector<256x128xbf16>
    %cst_16 = arith.constant dense<0.000000e+00> : vector<8x128xf32>
    %25 = tpu.matmul %23, %24, %cst_16 {dimension_numbers = #tpu.dot_dimension_numbers<[1], [0], [0], [1], [0, 0, 1, 1], [], []>} : vector<8x256xbf16>, vector<256x128xbf16>, vector<8x128xf32> -> vector<8x128xf32>
    %c0_17 = arith.constant 0 : index
    %c0_18 = arith.constant 0 : index
    %26 = vector.load %arg7[%c0_17, %c0_18] : memref<1x128xf32, #tpu.memory_space<vmem>>, vector<1x128xf32>
    %27 = vector.broadcast %26 : vector<1x128xf32> to vector<8x128xf32>
    %28 = arith.addf %25, %27 : vector<8x128xf32>
    %cst_19 = arith.constant 0.000000e+00 : f32
    %29 = vector.broadcast %cst_19 : f32 to vector<8x128xf32>
    %30 = arith.cmpf ogt, %28, %29 : vector<8x128xf32>
    %cst_20 = arith.constant 2.000000e-01 : f32
    %31 = vector.broadcast %cst_20 : f32 to vector<8x128xf32>
    %32 = arith.mulf %31, %28 : vector<8x128xf32>
    %33 = arith.select %30, %28, %32 : vector<8x128xi1>, vector<8x128xf32>
    %c0_21 = arith.constant 0 : index
    %c0_22 = arith.constant 0 : index
    %34 = vector.load %arg8[%c0_21, %c0_22] : memref<1x128xf32, #tpu.memory_space<vmem>>, vector<1x128xf32>
    %35 = vector.broadcast %34 : vector<1x128xf32> to vector<8x128xf32>
    %36 = arith.mulf %33, %35 : vector<8x128xf32>
    %cst_23 = arith.constant dense<0.000000e+00> : vector<8xf32>
    %37 = vector.multi_reduction <add>, %36, %cst_23 [1] : vector<8x128xf32> to vector<8xf32>
    %38 = vector.shape_cast %37 : vector<8xf32> to vector<8x1xf32>
    %c0_24 = arith.constant 0 : index
    %c0_25 = arith.constant 0 : index
    %39 = vector.load %arg9[%c0_24, %c0_25] : memref<1x1xf32, #tpu.memory_space<vmem>>, vector<1x1xf32>
    %40 = vector.broadcast %39 : vector<1x1xf32> to vector<8x1xf32>
    %41 = arith.addf %38, %40 : vector<8x1xf32>
    %42 = arith.negf %41 : vector<8x1xf32>
    %43 = math.exp %42 : vector<8x1xf32>
    %cst_26 = arith.constant 1.000000e+00 : f32
    %44 = vector.broadcast %cst_26 : f32 to vector<8x1xf32>
    %45 = arith.addf %44, %43 : vector<8x1xf32>
    %46 = arith.divf %44, %45 : vector<8x1xf32>
    %c0_27 = arith.constant 0 : index
    %c0_28 = arith.constant 0 : index
    %47 = vector.load %arg10[%c0_27, %c0_28] : memref<8x1xf32, #tpu.memory_space<vmem>>, vector<8x1xf32>
    tpu.vector_store %arg10[%c0_27, %c0_28], %46 {strides = array<i32>} : memref<8x1xf32, #tpu.memory_space<vmem>>, vector<8x1xf32>,
    return
  }
  func.func @transform_0(%arg0: i32) -> (i32, i32) {
    %c0_i32 = arith.constant 0 : i32
    %c0_i32_0 = arith.constant 0 : i32
    return %arg0, %c0_i32 : i32, i32
  }
  func.func @transform_1(%arg0: i32) -> (i32, i32) {
    %c0_i32 = arith.constant 0 : i32
    %c0_i32_0 = arith.constant 0 : i32
    %c0_i32_1 = arith.constant 0 : i32
    return %c0_i32, %c0_i32_0 : i32, i32
  }
  func.func @transform_2(%arg0: i32) -> (i32, i32) {
    %c0_i32 = arith.constant 0 : i32
    %c0_i32_0 = arith.constant 0 : i32
    %c0_i32_1 = arith.constant 0 : i32
    return %c0_i32, %c0_i32_0 : i32, i32
  }
  func.func @transform_3(%arg0: i32) -> (i32, i32) {
    %c0_i32 = arith.constant 0 : i32
    %c0_i32_0 = arith.constant 0 : i32
    %c0_i32_1 = arith.constant 0 : i32
    return %c0_i32, %c0_i32_0 : i32, i32
  }
  func.func @transform_4(%arg0: i32) -> (i32, i32) {
    %c0_i32 = arith.constant 0 : i32
    %c0_i32_0 = arith.constant 0 : i32
    %c0_i32_1 = arith.constant 0 : i32
    return %c0_i32, %c0_i32_0 : i32, i32
  }
  func.func @transform_5(%arg0: i32) -> (i32, i32) {
    %c0_i32 = arith.constant 0 : i32
    %c0_i32_0 = arith.constant 0 : i32
    %c0_i32_1 = arith.constant 0 : i32
    return %c0_i32, %c0_i32_0 : i32, i32
  }
  func.func @transform_6(%arg0: i32) -> (i32, i32) {
    %c0_i32 = arith.constant 0 : i32
    %c0_i32_0 = arith.constant 0 : i32
    %c0_i32_1 = arith.constant 0 : i32
    return %c0_i32, %c0_i32_0 : i32, i32
  }
  func.func @transform_7(%arg0: i32) -> (i32, i32) {
    %c0_i32 = arith.constant 0 : i32
    %c0_i32_0 = arith.constant 0 : i32
    %c0_i32_1 = arith.constant 0 : i32
    return %c0_i32, %c0_i32_0 : i32, i32
  }
  func.func @transform_8(%arg0: i32) -> (i32, i32) {
    %c0_i32 = arith.constant 0 : i32
    %c0_i32_0 = arith.constant 0 : i32
    %c0_i32_1 = arith.constant 0 : i32
    return %c0_i32, %c0_i32_0 : i32, i32
  }
  func.func @transform_9(%arg0: i32) -> (i32, i32) {
    %c0_i32 = arith.constant 0 : i32
    %c0_i32_0 = arith.constant 0 : i32
    return %arg0, %c0_i32 : i32, i32
  }
}

</mosaic_0001>

<bundles_post_ra>
// kernel: tpu_custom_call.1
= control target key start
LH: loop header
LB: loop body
LE: loop exit
PB: predicated region body
PF: predicated region fallthrough
CT: control target
= control target key end

     0   :  { %s3605_s0 = inlined_call_operand.hbm [shape: f32[8,896], index: 0, kind: input, shape index: {}]   ;;  %s3606_s1 = inlined_call_operand.hbm [shape: bf16[896,512], index: 1, kind: input, shape index: {}]   ;;  %s3607_s2 = inlined_call_operand.vmem [shape: f32[1,512], index: 2, kind: input, shape index: {}]   ;;  %s3608_s3 = inlined_call_operand.hbm [shape: bf16[512,256], index: 3, kind: input, shape index: {}]   ;;  %s3609_s4 = inlined_call_operand.vmem [shape: f32[1,256], index: 4, kind: input, shape index: {}]   ;;  %s3610_s5 = inlined_call_operand.hbm [shape: bf16[256,128], index: 5, kind: input, shape index: {}]   ;;  %s3611_s6 = inlined_call_operand.vmem [shape: f32[1,128], index: 6, kind: input, shape index: {}]   ;;  %s3612_s7 = inlined_call_operand.vmem [shape: f32[1,128], index: 7, kind: input, shape index: {}]   ;;  %s3613_s8 = inlined_call_operand.<no memory space> [shape: f32[1,1], index: 8, kind: input, shape index: {}]   ;;  %s3614_s9 = inlined_call_operand.vmem [shape: f32[8,1], index: 9, kind: output, shape index: {}]  }
   0x1   :  { %v14_v0 = vstv %s3613_s8 }
   0x2   :  { %15 = vst [vmem:[#allocation2] sm:$0x1] %v14_v0 }
   0x3   :  { %16 = vsyncpa [#allocation4], 0 }
   0x4   :  { %17 = vsyncpa [#allocation6], 0 }
   0x5   :  { %18 = vsyncpa [#allocation9], 0  ;;  %s3428_s11 = smov [#allocation5]   ;;  %s3334_s15 = scalar_lea.hbm %s3606_s1, 28672 }
   0x6   :  { %s34_s12 = sshll.u32 %s3428_s11, 4  ;;  %p3335_p0 = scmp.ne.s32.totalorder %s3606_s1, %s3334_s15  ;;  %s35_s12 = int_to_ptr.vmem [resolvable:$true] %s34_s12 }
   0x7   :  { %p3338_p1 = scmp.lt.u32.totalorder %s3334_s15, %s3606_s1 }
   0x9   :  { %p3340_p2 = pnand %p3338_p1, %p3335_p0 }
   0xb   :  { %3343 = shalt.err (!%p3340_p2)
}
   0xc   :  { %s3344_s8 = scalar_lea.vmem %s35_s12, 28672  ;;  %p3349_p4 = scmp.lt.s32.totalorder %s35_s12, %s35_s12 }
   0xd   :  { %p3345_p3 = scmp.ne.s32.totalorder %s35_s12, %s3344_s8  ;;  %p3350_p5 = scmp.lt.s32.totalorder %s3344_s8, %s3344_s8 }
   0xf   :  { %p3351_p6 = por %p3350_p5, %p3349_p4 }
  0x11   :  { %p3352_p7 = pnand %p3351_p6, %p3345_p3 }
  0x13   :  { %3355 = shalt.err (!%p3352_p7)
}
  0x14   :  { %s3429_s20 = smov 256   ;;  %s3430_s21 = smov 16  }
  0x15   :  { %40 = dma.hbm_to_vmem [thread:$0]  %s3606_s1, 28672, %s35_s12, [#allocation6], %s3429_s20, %s3429_s20, %s3430_s21  }
  0x16   :  { %s3431_s24 = smov [#allocation3]   ;;  %s3432_s26 = smov [#allocation7]  }
  0x17   :  { %s25_s25 = sshll.u32 %s3431_s24, 4  ;;  %s48_s27 = sshll.u32 %s3432_s26, 4  ;;  %s26_s25 = int_to_ptr.vmem [resolvable:$true] %s25_s25  ;;  %s49_s27 = int_to_ptr.vmem [resolvable:$true] %s48_s27 }
  0x18   :  { %s3356_s30 = scalar_lea.hbm %s3605_s0, 896 }
  0x19   :  { %p3357_p8 = scmp.ne.s32.totalorder %s3605_s0, %s3356_s30  ;;  %p3360_p9 = scmp.lt.u32.totalorder %s3356_s30, %s3605_s0 }
  0x1b   :  { %p3362_p10 = pnand %p3360_p9, %p3357_p8 }
  0x1d   :  { %3365 = shalt.err (!%p3362_p10)
}
  0x1e   :  { %s3366_s1 = scalar_lea.vmem %s26_s25, 896  ;;  %p3371_p12 = scmp.lt.s32.totalorder %s26_s25, %s26_s25 }
  0x1f   :  { %p3367_p11 = scmp.ne.s32.totalorder %s26_s25, %s3366_s1  ;;  %p3372_p13 = scmp.lt.s32.totalorder %s3366_s1, %s3366_s1 }
  0x21   :  { %p3373_p0 = por %p3372_p13, %p3371_p12 }
  0x23   :  { %p3374_p1 = pnand %p3373_p0, %p3367_p11 }
  0x25   :  { %3377 = shalt.err (!%p3374_p1)
}
  0x26   :  { %28 = dma.hbm_to_vmem [thread:$0]  %s3605_s0, 896, %s26_s25, [#allocation4]  }
  0x27   :  { %s3378_s18 = scalar_lea.hbm %s3608_s3, 8192 }
  0x28   :  { %p3379_p2 = scmp.ne.s32.totalorder %s3608_s3, %s3378_s18  ;;  %p3382_p3 = scmp.lt.u32.totalorder %s3378_s18, %s3608_s3 }
  0x2a   :  { %p3384_p4 = pnand %p3382_p3, %p3379_p2 }
  0x2c   :  { %3387 = shalt.err (!%p3384_p4)
}
  0x2d   :  { %s3388_s22 = scalar_lea.vmem %s49_s27, 8192  ;;  %p3393_p6 = scmp.lt.s32.totalorder %s49_s27, %s49_s27 }
  0x2e   :  { %p3389_p5 = scmp.ne.s32.totalorder %s49_s27, %s3388_s22  ;;  %p3394_p7 = scmp.lt.s32.totalorder %s3388_s22, %s3388_s22 }
  0x30   :  { %p3395_p8 = por %p3394_p7, %p3393_p6 }
  0x32   :  { %p3396_p9 = pnand %p3395_p8, %p3389_p5 }
  0x34   :  { %3399 = shalt.err (!%p3396_p9)
}
  0x35   :  { %s3433_s0 = smov 128   ;;  %s3434_s23 = smov 8  }
  0x36   :  { %54 = dma.hbm_to_vmem [thread:$0]  %s3608_s3, 8192, %s49_s27, [#allocation6], %s3433_s0, %s3433_s0, %s3434_s23  }
  0x37   :  { %s3435_s26 = smov [#allocation8]   ;;  %s3400_s10 = scalar_lea.hbm %s3610_s5, 2048 }
  0x38   :  { %s62_s28 = sshll.u32 %s3435_s26, 4  ;;  %p3401_p10 = scmp.ne.s32.totalorder %s3610_s5, %s3400_s10  ;;  %s63_s28 = int_to_ptr.vmem [resolvable:$true] %s62_s28 }
  0x39   :  { %p3404_p11 = scmp.lt.u32.totalorder %s3400_s10, %s3610_s5 }
  0x3b   :  { %p3406_p12 = pnand %p3404_p11, %p3401_p10 }
  0x3d   :  { %3409 = shalt.err (!%p3406_p12)
}
  0x3e   :  { %s3410_s12 = scalar_lea.vmem %s63_s28, 2048  ;;  %p3415_p0 = scmp.lt.s32.totalorder %s63_s28, %s63_s28 }
  0x3f   :  { %p3411_p13 = scmp.ne.s32.totalorder %s63_s28, %s3410_s12  ;;  %p3416_p1 = scmp.lt.s32.totalorder %s3410_s12, %s3410_s12 }
  0x41   :  { %p3417_p2 = por %p3416_p1, %p3415_p0 }
  0x43   :  { %p3418_p3 = pnand %p3417_p2, %p3411_p13 }
  0x45   :  { %3421 = shalt.err (!%p3418_p3)
}
  0x46   :  { %s3436_s3 = smov 64   ;;  %s3437_s27 = smov 4  }
  0x47   :  { %68 = dma.hbm_to_vmem [thread:$0]  %s3610_s5, 2048, %s63_s28, [#allocation9], %s3436_s3, %s3436_s3, %s3437_s27  }
  0x48   :  { %3422 = dma.done.wait [#allocation4], 896  }
  0x49   :  { %3423 = vsyncadd [#allocation4], 4294966400 }
  0x4a   :  { %3424 = dma.done.wait [#allocation6], 36864  }
  0x4b   :  { %3425 = vsyncadd [#allocation6], 4294930432 }
  0x4c   :  { %3426 = dma.done.wait [#allocation9], 2048  }
  0x4d   :  { %3427 = vsyncadd [#allocation9], 4294965248  ;;  %v2882_v1 = vld [vmem:[#allocation5 + $0x4] ss:$16 sps:$4 sm:$0xff]   ;;  %v2886_v3 = vld [vmem:[#allocation5] ss:$16 sps:$4 sm:$0xff]  }
  0x4e   :  { %v2884_v2 = vld [vmem:[#allocation5 + $0x204] ss:$16 sps:$4 sm:$0xff]   ;;  %1468 = vmatprep.subr.bf16.mxu1 %v2882_v1  ;;  %v2887_v4 = vld [vmem:[#allocation5 + $0x200] ss:$16 sps:$4 sm:$0xff]   ;;  %vm2500_vm7 = vcmask 7168  }
  0x4f   :  { %1509 = vmatprep.subr.bf16.mxu0 %v2884_v2  ;;  %v2888_v5 = vld [vmem:[#allocation5 + $0x24] ss:$16 sps:$4 sm:$0xff]   ;;  %1469 = vmatpush1.bf16.msra.mxu1 %v2886_v3  ;;  %v2892_v7 = vld [vmem:[#allocation5 + $0x20] ss:$16 sps:$4 sm:$0xff]  }
  0x50   :  { %1510 = vmatpush1.bf16.msra.mxu0 %v2887_v4  ;;  %v2890_v6 = vld [vmem:[#allocation5 + $0x224] ss:$16 sps:$4 sm:$0xff]   ;;  %1470 = vmatprep.subr.bf16.mxu1 %v2888_v5  ;;  %v2893_v8 = vld [vmem:[#allocation5 + $0x220] ss:$16 sps:$4 sm:$0xff]   ;;  %v88_v5 = vld [vmem:[#allocation3] sm:$0xff] }
  0x51   :  { %1511 = vmatprep.subr.bf16.mxu0 %v2890_v6  ;;  %v2894_v9 = vld [vmem:[#allocation5 + $0x44] ss:$16 sps:$4 sm:$0xff]   ;;  %v2898_v11 = vld [vmem:[#allocation5 + $0x40] ss:$16 sps:$4 sm:$0xff]  }
  0x52   :  { %v2896_v10 = vld [vmem:[#allocation5 + $0x244] ss:$16 sps:$4 sm:$0xff]   ;;  %v2899_v12 = vld [vmem:[#allocation5 + $0x240] ss:$16 sps:$4 sm:$0xff]  }
  0x53   :  { %1471 = vmatpush1.bf16.msra.mxu1 %v2892_v7  ;;  %v2900_v13 = vld [vmem:[#allocation5 + $0x64] ss:$16 sps:$4 sm:$0xff]   ;;  %v2904_v15 = vld [vmem:[#allocation5 + $0x60] ss:$16 sps:$4 sm:$0xff]   ;;  %v90_v7 = vld [vmem:[#allocation3 + $0x10] sm:$0xff] }
  0x54   :  { %1512 = vmatpush1.bf16.msra.mxu0 %v2893_v8  ;;  %1472 = vmatprep.subr.bf16.mxu1 %v2894_v9  ;;  %v2902_v14 = vld [vmem:[#allocation5 + $0x264] ss:$16 sps:$4 sm:$0xff]   ;;  %v2905_v16 = vld [vmem:[#allocation5 + $0x260] ss:$16 sps:$4 sm:$0xff]   ;;  %v2983_v8 = vld [vmem:[#allocation5 + $0xc] ss:$16 sps:$4 sm:$0xff]   ;;  %v3546_v9 = vpack.c.bf16 %v88_v5, %v88_v5 }
  0x55   :  { %1513 = vmatprep.subr.bf16.mxu0 %v2896_v10  ;;  %v2906_v17 = vld [vmem:[#allocation5 + $0x84] ss:$16 sps:$4 sm:$0xff]   ;;  %v2910_v19 = vld [vmem:[#allocation5 + $0x80] ss:$16 sps:$4 sm:$0xff]   ;;  %v3067_v5 = vld [vmem:[#allocation5 + $0x1cc] ss:$16 sps:$4 sm:$0xff]  }
  0x56   :  { %v2908_v18 = vld [vmem:[#allocation5 + $0x284] ss:$16 sps:$4 sm:$0xff]   ;;  %v2911_v20 = vld [vmem:[#allocation5 + $0x280] ss:$16 sps:$4 sm:$0xff]  }
  0x57   :  { %1473 = vmatpush1.bf16.msra.mxu1 %v2898_v11  ;;  %v2912_v21 = vld [vmem:[#allocation5 + $0xa4] ss:$16 sps:$4 sm:$0xff]   ;;  %v2916_v23 = vld [vmem:[#allocation5 + $0xa0] ss:$16 sps:$4 sm:$0xff]   ;;  %v2981_v11 = vld [vmem:[#allocation5 + $0x8] ss:$16 sps:$4 sm:$0xff]  }
  0x58   :  { %1514 = vmatpush1.bf16.msra.mxu0 %v2899_v12  ;;  %1474 = vmatprep.subr.bf16.mxu1 %v2900_v13  ;;  %v2914_v22 = vld [vmem:[#allocation5 + $0x2a4] ss:$16 sps:$4 sm:$0xff]   ;;  %v2917_v24 = vld [vmem:[#allocation5 + $0x2a0] ss:$16 sps:$4 sm:$0xff]   ;;  %v3548_v12 = vpack.c.bf16 %v90_v7, %v90_v7  ;;  %v3065_v7 = vld [vmem:[#allocation5 + $0x1c8] ss:$16 sps:$4 sm:$0xff]  }
  0x59   :  { %1515 = vmatprep.subr.bf16.mxu0 %v2902_v14  ;;  %v2918_v25 = vld [vmem:[#allocation5 + $0xc4] ss:$16 sps:$4 sm:$0xff]   ;;  %v2922_v27 = vld [vmem:[#allocation5 + $0xc0] ss:$16 sps:$4 sm:$0xff]   ;;  %v2989_v14 = vld [vmem:[#allocation5 + $0x2c] ss:$16 sps:$4 sm:$0xff]  }
  0x5a   :  { %v2920_v26 = vld [vmem:[#allocation5 + $0x2c4] ss:$16 sps:$4 sm:$0xff]   ;;  %v2923_v28 = vld [vmem:[#allocation5 + $0x2c0] ss:$16 sps:$4 sm:$0xff]  }
  0x5b   :  { %1475 = vmatpush1.bf16.msra.mxu1 %v2904_v15  ;;  %v2924_v29 = vld [vmem:[#allocation5 + $0xe4] ss:$16 sps:$4 sm:$0xff]   ;;  %v2928_v31 = vld [vmem:[#allocation5 + $0xe0] ss:$16 sps:$4 sm:$0xff]  }
  0x5c   :  { %1516 = vmatpush1.bf16.msra.mxu0 %v2905_v16  ;;  %1476 = vmatprep.subr.bf16.mxu1 %v2906_v17  ;;  %v2926_v30 = vld [vmem:[#allocation5 + $0x2e4] ss:$16 sps:$4 sm:$0xff]   ;;  %v2929_v32 = vld [vmem:[#allocation5 + $0x2e0] ss:$16 sps:$4 sm:$0xff]   ;;  %v2987_v16 = vld [vmem:[#allocation5 + $0x28] ss:$16 sps:$4 sm:$0xff]  }
  0x5d   :  { %1517 = vmatprep.subr.bf16.mxu0 %v2908_v18  ;;  %v2930_v33 = vld [vmem:[#allocation5 + $0x104] ss:$16 sps:$4 sm:$0xff]   ;;  %v2934_v35 = vld [vmem:[#allocation5 + $0x100] ss:$16 sps:$4 sm:$0xff]   ;;  %v2995_v18 = vld [vmem:[#allocation5 + $0x4c] ss:$16 sps:$4 sm:$0xff]  }
  0x5e   :  { %v2932_v34 = vld [vmem:[#allocation5 + $0x304] ss:$16 sps:$4 sm:$0xff]   ;;  %v2935_v36 = vld [vmem:[#allocation5 + $0x300] ss:$16 sps:$4 sm:$0xff]  }
  0x5f   :  { %1477 = vmatpush1.bf16.msra.mxu1 %v2910_v19  ;;  %v2936_v37 = vld [vmem:[#allocation5 + $0x124] ss:$16 sps:$4 sm:$0xff]   ;;  %v2940_v39 = vld [vmem:[#allocation5 + $0x120] ss:$16 sps:$4 sm:$0xff]  }
  0x60   :  { %1518 = vmatpush1.bf16.msra.mxu0 %v2911_v20  ;;  %1478 = vmatprep.subr.bf16.mxu1 %v2912_v21  ;;  %v2938_v38 = vld [vmem:[#allocation5 + $0x324] ss:$16 sps:$4 sm:$0xff]   ;;  %v2941_v40 = vld [vmem:[#allocation5 + $0x320] ss:$16 sps:$4 sm:$0xff]   ;;  %v2993_v20 = vld [vmem:[#allocation5 + $0x48] ss:$16 sps:$4 sm:$0xff]  }
  0x61   :  { %1519 = vmatprep.subr.bf16.mxu0 %v2914_v22  ;;  %v2942_v41 = vld [vmem:[#allocation5 + $0x144] ss:$16 sps:$4 sm:$0xff]   ;;  %v2946_v43 = vld [vmem:[#allocation5 + $0x140] ss:$16 sps:$4 sm:$0xff]   ;;  %v3001_v22 = vld [vmem:[#allocation5 + $0x6c] ss:$16 sps:$4 sm:$0xff]  }
  0x62   :  { %v2944_v42 = vld [vmem:[#allocation5 + $0x344] ss:$16 sps:$4 sm:$0xff]   ;;  %v2947_v44 = vld [vmem:[#allocation5 + $0x340] ss:$16 sps:$4 sm:$0xff]  }
  0x63   :  { %1479 = vmatpush1.bf16.msra.mxu1 %v2916_v23  ;;  %v2948_v45 = vld [vmem:[#allocation5 + $0x164] ss:$16 sps:$4 sm:$0xff]   ;;  %v2952_v48 = vld [vmem:[#allocation5 + $0x160] ss:$16 sps:$4 sm:$0xff]  }
  0x64   :  { %1520 = vmatpush1.bf16.msra.mxu0 %v2917_v24  ;;  %1480 = vmatprep.subr.bf16.mxu1 %v2918_v25  ;;  %v2950_v46 = vld [vmem:[#allocation5 + $0x364] ss:$16 sps:$4 sm:$0xff]   ;;  %v2953_v51 = vld [vmem:[#allocation5 + $0x360] ss:$16 sps:$4 sm:$0xff]   ;;  %v2999_v24 = vld [vmem:[#allocation5 + $0x68] ss:$16 sps:$4 sm:$0xff]  }
  0x65   :  { %1521 = vmatprep.subr.bf16.mxu0 %v2920_v26  ;;  %v89_v47 = vld [vmem:[#allocation3 + $0x8] sm:$0xff]  ;;  %v91_v50 = vld [vmem:[#allocation3 + $0x18] sm:$0xff]  ;;  %v3007_v26 = vld [vmem:[#allocation5 + $0x8c] ss:$16 sps:$4 sm:$0xff]  }
  0x66   :  { %v3540_v49 = vpack.c.bf16 %v89_v47, %v89_v47  ;;  %v2954_v52 = vld [vmem:[#allocation5 + $0x184] ss:$16 sps:$4 sm:$0xff]   ;;  %v3542_v53 = vpack.c.bf16 %v91_v50, %v91_v50  ;;  %v2958_v55 = vld [vmem:[#allocation5 + $0x180] ss:$16 sps:$4 sm:$0xff]   ;;  %v3035_v50 = vld [vmem:[#allocation5 + $0x128] ss:$16 sps:$4 sm:$0xff]  }
  0x67   :  { %1481 = vmatpush1.bf16.msra.mxu1 %v2922_v27  ;;  %v2956_v54 = vld [vmem:[#allocation5 + $0x384] ss:$16 sps:$4 sm:$0xff]   ;;  %v2959_v56 = vld [vmem:[#allocation5 + $0x380] ss:$16 sps:$4 sm:$0xff]  }
  0x68   :  { %1522 = vmatpush1.bf16.msra.mxu0 %v2923_v28  ;;  %1482 = vmatprep.subr.bf16.mxu1 %v2924_v29  ;;  %v2960_v57 = vld [vmem:[#allocation5 + $0x1a4] ss:$16 sps:$4 sm:$0xff]   ;;  %v2964_v59 = vld [vmem:[#allocation5 + $0x1a0] ss:$16 sps:$4 sm:$0xff]   ;;  %v3005_v28 = vld [vmem:[#allocation5 + $0x88] ss:$16 sps:$4 sm:$0xff]  }
  0x69   :  { %1523 = vmatprep.subr.bf16.mxu0 %v2926_v30  ;;  %1500 = vmatprep.mubr.bf16.mxu1 %v3540_v49  ;;  %v2962_v58 = vld [vmem:[#allocation5 + $0x3a4] ss:$16 sps:$4 sm:$0xff]   ;;  %v2965_v60 = vld [vmem:[#allocation5 + $0x3a0] ss:$16 sps:$4 sm:$0xff]   ;;  %v3013_v30 = vld [vmem:[#allocation5 + $0xac] ss:$16 sps:$4 sm:$0xff]  }
  0x6a   :  { %1541 = vmatprep.mubr.bf16.mxu0 %v3542_v53  ;;  %v2966_v61 = vld [vmem:[#allocation5 + $0x1c4] ss:$16 sps:$4 sm:$0xff]   ;;  %v2970_v63 = vld [vmem:[#allocation5 + $0x1c0] ss:$16 sps:$4 sm:$0xff]  }
  0x6b   :  { %1483 = vmatpush1.bf16.msra.mxu1 %v2928_v31  ;;  %v2968_v62 = vld [vmem:[#allocation5 + $0x3c4] ss:$16 sps:$4 sm:$0xff]   ;;  %v2971_v0 = vld [vmem:[#allocation5 + $0x3c0] ss:$16 sps:$4 sm:$0xff]  }
  0x6c   :  { %1524 = vmatpush1.bf16.msra.mxu0 %v2929_v32  ;;  %1484 = vmatprep.subr.bf16.mxu1 %v2930_v33  ;;  %v2972_v1 = vld [vmem:[#allocation5 + $0x1e4] ss:$16 sps:$4 sm:$0xff]   ;;  %v2976_v3 = vld [vmem:[#allocation5 + $0x1e0] ss:$16 sps:$4 sm:$0xff]   ;;  %v3011_v32 = vld [vmem:[#allocation5 + $0xa8] ss:$16 sps:$4 sm:$0xff]  }
  0x6d   :  { %1525 = vmatprep.subr.bf16.mxu0 %v2932_v34  ;;  %v2974_v2 = vld [vmem:[#allocation5 + $0x3e4] ss:$16 sps:$4 sm:$0xff]   ;;  %v2977_v4 = vld [vmem:[#allocation5 + $0x3e0] ss:$16 sps:$4 sm:$0xff]   ;;  %v3019_v34 = vld [vmem:[#allocation5 + $0xcc] ss:$16 sps:$4 sm:$0xff]  }
  0x6e   :  { %v2980_v6 = vld [vmem:[#allocation5 + $0x404] ss:$16 sps:$4 sm:$0xff]   ;;  %v2978_v10 = vld [vmem:[#allocation5 + $0x400] ss:$16 sps:$4 sm:$0xff]  }
  0x6f   :  { %1485 = vmatpush1.bf16.msra.mxu1 %v2934_v35  ;;  %v2986_v13 = vld [vmem:[#allocation5 + $0x424] ss:$16 sps:$4 sm:$0xff]   ;;  %v2984_v15 = vld [vmem:[#allocation5 + $0x420] ss:$16 sps:$4 sm:$0xff]  }
  0x70   :  { %1526 = vmatpush1.bf16.msra.mxu0 %v2935_v36  ;;  %1486 = vmatprep.subr.bf16.mxu1 %v2936_v37  ;;  %v2992_v17 = vld [vmem:[#allocation5 + $0x444] ss:$16 sps:$4 sm:$0xff]   ;;  %v2990_v19 = vld [vmem:[#allocation5 + $0x440] ss:$16 sps:$4 sm:$0xff]  }
  0x71   :  { %1527 = vmatprep.subr.bf16.mxu0 %v2938_v38  ;;  %v2998_v21 = vld [vmem:[#allocation5 + $0x464] ss:$16 sps:$4 sm:$0xff]   ;;  %v2996_v23 = vld [vmem:[#allocation5 + $0x460] ss:$16 sps:$4 sm:$0xff]   ;;  %v3017_v38 = vld [vmem:[#allocation5 + $0xc8] ss:$16 sps:$4 sm:$0xff]  }
  0x72   :  { %v3004_v25 = vld [vmem:[#allocation5 + $0x484] ss:$16 sps:$4 sm:$0xff]   ;;  %v3002_v27 = vld [vmem:[#allocation5 + $0x480] ss:$16 sps:$4 sm:$0xff]  }
  0x73   :  { %1487 = vmatpush1.bf16.msra.mxu1 %v2940_v39  ;;  %v3010_v29 = vld [vmem:[#allocation5 + $0x4a4] ss:$16 sps:$4 sm:$0xff]   ;;  %v3008_v31 = vld [vmem:[#allocation5 + $0x4a0] ss:$16 sps:$4 sm:$0xff]  }
  0x74   :  { %1528 = vmatpush1.bf16.msra.mxu0 %v2941_v40  ;;  %1488 = vmatprep.subr.bf16.mxu1 %v2942_v41  ;;  %v3016_v33 = vld [vmem:[#allocation5 + $0x4c4] ss:$16 sps:$4 sm:$0xff]   ;;  %v3014_v36 = vld [vmem:[#allocation5 + $0x4c0] ss:$16 sps:$4 sm:$0xff]   ;;  %v3025_v40 = vld [vmem:[#allocation5 + $0xec] ss:$16 sps:$4 sm:$0xff]  }
  0x75   :  { %1529 = vmatprep.subr.bf16.mxu0 %v2944_v42  ;;  %v93_v35 = vld [vmem:[#allocation3 + $0x28] sm:$0xff]  ;;  %v3023_v42 = vld [vmem:[#allocation5 + $0xe8] ss:$16 sps:$4 sm:$0xff]  }
  0x76   :  { %v3553_v37 = vpack.c.bf16 %v93_v35, %v93_v35  ;;  %v3022_v39 = vld [vmem:[#allocation5 + $0x4e4] ss:$16 sps:$4 sm:$0xff]   ;;  %v3020_v41 = vld [vmem:[#allocation5 + $0x4e0] ss:$16 sps:$4 sm:$0xff]  }
  0x77   :  { %1489 = vmatpush1.bf16.msra.mxu1 %v2946_v43  ;;  %v3028_v43 = vld [vmem:[#allocation5 + $0x504] ss:$16 sps:$4 sm:$0xff]  }
  0x78   :  { %1530 = vmatpush1.bf16.msra.mxu0 %v2947_v44  ;;  %1490 = vmatprep.subr.bf16.mxu1 %v2948_v45  ;;  %v3031_v44 = vld [vmem:[#allocation5 + $0x10c] ss:$16 sps:$4 sm:$0xff]   ;;  %v3026_v45 = vld [vmem:[#allocation5 + $0x500] ss:$16 sps:$4 sm:$0xff]   ;;  %v3034_v47 = vld [vmem:[#allocation5 + $0x524] ss:$16 sps:$4 sm:$0xff]  }
  0x79   :  { %1531 = vmatprep.subr.bf16.mxu0 %v2950_v46  ;;  %v3029_v46 = vld [vmem:[#allocation5 + $0x108] ss:$16 sps:$4 sm:$0xff]   ;;  %v3106_v35 = vld [vmem:[#allocation5 + $0x6a4] ss:$16 sps:$4 sm:$0xff]  }
  0x7b   :  { %1491 = vmatpush1.bf16.msra.mxu1 %v2952_v48  ;;  %v3037_v48 = vld [vmem:[#allocation5 + $0x12c] ss:$16 sps:$4 sm:$0xff]  }
  0x7c   :  { %1532 = vmatpush1.bf16.msra.mxu0 %v2953_v51  ;;  %1492 = vmatprep.subr.bf16.mxu1 %v2954_v52  ;;  %v3040_v51 = vld [vmem:[#allocation5 + $0x544] ss:$16 sps:$4 sm:$0xff]   ;;  %v3043_v52 = vld [vmem:[#allocation5 + $0x14c] ss:$16 sps:$4 sm:$0xff]  }
  0x7d   :  { %1533 = vmatprep.subr.bf16.mxu0 %v2956_v54  ;;  %v3038_v54 = vld [vmem:[#allocation5 + $0x540] ss:$16 sps:$4 sm:$0xff]  }
  0x7f   :  { %1493 = vmatpush1.bf16.msra.mxu1 %v2958_v55  ;;  %v3041_v55 = vld [vmem:[#allocation5 + $0x148] ss:$16 sps:$4 sm:$0xff]  }
  0x80   :  { %1534 = vmatpush1.bf16.msra.mxu0 %v2959_v56  ;;  %1494 = vmatprep.subr.bf16.mxu1 %v2960_v57  ;;  %v3046_v56 = vld [vmem:[#allocation5 + $0x564] ss:$16 sps:$4 sm:$0xff]   ;;  %v3049_v57 = vld [vmem:[#allocation5 + $0x16c] ss:$16 sps:$4 sm:$0xff]  }
  0x81   :  { %1535 = vmatprep.subr.bf16.mxu0 %v2962_v58  ;;  %v3044_v58 = vld [vmem:[#allocation5 + $0x560] ss:$16 sps:$4 sm:$0xff]  }
  0x83   :  { %1495 = vmatpush1.bf16.msra.mxu1 %v2964_v59  ;;  %v3047_v59 = vld [vmem:[#allocation5 + $0x168] ss:$16 sps:$4 sm:$0xff]  }
  0x84   :  { %1536 = vmatpush1.bf16.msra.mxu0 %v2965_v60  ;;  %1496 = vmatprep.subr.bf16.mxu1 %v2966_v61  ;;  %v3052_v60 = vld [vmem:[#allocation5 + $0x584] ss:$16 sps:$4 sm:$0xff]   ;;  %v3055_v61 = vld [vmem:[#allocation5 + $0x18c] ss:$16 sps:$4 sm:$0xff]  }
  0x85   :  { %1537 = vmatprep.subr.bf16.mxu0 %v2968_v62  ;;  %v3050_v62 = vld [vmem:[#allocation5 + $0x580] ss:$16 sps:$4 sm:$0xff]  }
  0x87   :  { %1497 = vmatpush1.bf16.msra.mxu1 %v2970_v63  ;;  %v3053_v63 = vld [vmem:[#allocation5 + $0x188] ss:$16 sps:$4 sm:$0xff]  }
  0x88   :  { %1538 = vmatpush1.bf16.msra.mxu0 %v2971_v0  ;;  %1498 = vmatprep.subr.bf16.mxu1 %v2972_v1  ;;  %v3058_v0 = vld [vmem:[#allocation5 + $0x5a4] ss:$16 sps:$4 sm:$0xff]   ;;  %v3061_v1 = vld [vmem:[#allocation5 + $0x1ac] ss:$16 sps:$4 sm:$0xff]  }
  0x89   :  { %1539 = vmatprep.subr.bf16.mxu0 %v2974_v2  ;;  %v3056_v2 = vld [vmem:[#allocation5 + $0x5a0] ss:$16 sps:$4 sm:$0xff]  }
  0x8b   :  { %1499 = vmatpush1.bf16.msra.mxu1 %v2976_v3  ;;  %v3059_v3 = vld [vmem:[#allocation5 + $0x1a8] ss:$16 sps:$4 sm:$0xff]  }
  0x8c   :  { %1540 = vmatpush1.bf16.msra.mxu0 %v2977_v4  ;;  %1632 = vmatprep.subr.bf16.mxu1 %v2983_v8  ;;  %v3064_v4 = vld [vmem:[#allocation5 + $0x5c4] ss:$16 sps:$4 sm:$0xff]  }
  0x8d   :  { %1550 = vmatprep.subr.bf16.mxu0 %v2980_v6  ;;  %v3062_v6 = vld [vmem:[#allocation5 + $0x5c0] ss:$16 sps:$4 sm:$0xff]   ;;  %v3070_v8 = vld [vmem:[#allocation5 + $0x5e4] ss:$16 sps:$4 sm:$0xff]  }
  0x8e   :  { %1501 = vmatmul.mubr.bf16.vlgmr.msra.gmra.mrb[0].mxu1 %v3546_v9 }
  0x8f   :  { %1542 = vmatmul.mubr.bf16.vlgmr.msra.gmra.mrb[0].mxu0 %v3548_v12  ;;  %1633 = vmatpush1.bf16.msra.mxu1 %v2981_v11  ;;  %v3068_v11 = vld [vmem:[#allocation5 + $0x5e0] ss:$16 sps:$4 sm:$0xff]  }
  0x90   :  { %1551 = vmatpush1.bf16.msra.mxu0 %v2978_v10  ;;  %1634 = vmatprep.subr.bf16.mxu1 %v2989_v14  ;;  %v3073_v10 = vld [vmem:[#allocation5 + $0x1ec] ss:$16 sps:$4 sm:$0xff]   ;;  %v3076_v14 = vld [vmem:[#allocation5 + $0x604] ss:$16 sps:$4 sm:$0xff]  }
  0x91   :  { %1552 = vmatprep.subr.bf16.mxu0 %v2986_v13  ;;  %1664 = vmatprep.mubr.bf16.mxu1 %v3540_v49  ;;  %v3032_v49 = vld [vmem:[#allocation5 + $0x520] ss:$16 sps:$4 sm:$0xff]   ;;  %v3071_v13 = vld [vmem:[#allocation5 + $0x1e8] ss:$16 sps:$4 sm:$0xff]  }
  0x92   :  { %1582 = vmatprep.mubr.bf16.mxu0 %v3553_v37 }
  0x93   :  { %1635 = vmatpush1.bf16.msra.mxu1 %v2987_v16  ;;  %v3079_v16 = vld [vmem:[#allocation5 + $0x20c] ss:$16 sps:$4 sm:$0xff]  }
  0x94   :  { %1553 = vmatpush1.bf16.msra.mxu0 %v2984_v15  ;;  %1636 = vmatprep.subr.bf16.mxu1 %v2995_v18  ;;  %v92_v15 = vld [vmem:[#allocation3 + $0x20] sm:$0xff] }
  0x95   :  { %1554 = vmatprep.subr.bf16.mxu0 %v2992_v17  ;;  %v3074_v17 = vld [vmem:[#allocation5 + $0x600] ss:$16 sps:$4 sm:$0xff]   ;;  %v3556_v18 = vpack.c.bf16 %v92_v15, %v92_v15  ;;  %v3140_v15 = vld [vmem:[#allocation5 + $0x3c8] ss:$16 sps:$4 sm:$0xff]  }
  0x97   :  { %1637 = vmatpush1.bf16.msra.mxu1 %v2993_v20  ;;  %v3082_v20 = vld [vmem:[#allocation5 + $0x624] ss:$16 sps:$4 sm:$0xff]  }
  0x98   :  { %1555 = vmatpush1.bf16.msra.mxu0 %v2990_v19  ;;  %1638 = vmatprep.subr.bf16.mxu1 %v3001_v22  ;;  %v3077_v19 = vld [vmem:[#allocation5 + $0x208] ss:$16 sps:$4 sm:$0xff]   ;;  %v3080_v22 = vld [vmem:[#allocation5 + $0x620] ss:$16 sps:$4 sm:$0xff]  }
  0x99   :  { %1556 = vmatprep.subr.bf16.mxu0 %v2998_v21  ;;  %v3085_v21 = vld [vmem:[#allocation5 + $0x22c] ss:$16 sps:$4 sm:$0xff]  }
  0x9b   :  { %1639 = vmatpush1.bf16.msra.mxu1 %v2999_v24  ;;  %v3088_v24 = vld [vmem:[#allocation5 + $0x644] ss:$16 sps:$4 sm:$0xff]  }
  0x9c   :  { %1557 = vmatpush1.bf16.msra.mxu0 %v2996_v23  ;;  %1640 = vmatprep.subr.bf16.mxu1 %v3007_v26  ;;  %v3083_v23 = vld [vmem:[#allocation5 + $0x228] ss:$16 sps:$4 sm:$0xff]   ;;  %v3438_v26 = vmov 0  }
  0x9d   :  { %1558 = vmatprep.subr.bf16.mxu0 %v3004_v25  ;;  %v3091_v25 = vld [vmem:[#allocation5 + $0x24c] ss:$16 sps:$4 sm:$0xff]  }
  0x9f   :  { %1641 = vmatpush1.bf16.msra.mxu1 %v3005_v28  ;;  %v3089_v28 = vld [vmem:[#allocation5 + $0x248] ss:$16 sps:$4 sm:$0xff]  }
  0xa0   :  { %1559 = vmatpush1.bf16.msra.mxu0 %v3002_v27  ;;  %1642 = vmatprep.subr.bf16.mxu1 %v3013_v30  ;;  %v3086_v27 = vld [vmem:[#allocation5 + $0x640] ss:$16 sps:$4 sm:$0xff]  }
  0xa1   :  { %1560 = vmatprep.subr.bf16.mxu0 %v3010_v29  ;;  %v3094_v29 = vld [vmem:[#allocation5 + $0x664] ss:$16 sps:$4 sm:$0xff]   ;;  %v3092_v30 = vld [vmem:[#allocation5 + $0x660] ss:$16 sps:$4 sm:$0xff]  }
  0xa3   :  { %1643 = vmatpush1.bf16.msra.mxu1 %v3011_v32  ;;  %v3100_v32 = vld [vmem:[#allocation5 + $0x684] ss:$16 sps:$4 sm:$0xff]  }
  0xa4   :  { %1561 = vmatpush1.bf16.msra.mxu0 %v3008_v31  ;;  %1644 = vmatprep.subr.bf16.mxu1 %v3019_v34  ;;  %v3095_v31 = vld [vmem:[#allocation5 + $0x268] ss:$16 sps:$4 sm:$0xff]   ;;  %v3098_v34 = vld [vmem:[#allocation5 + $0x680] ss:$16 sps:$4 sm:$0xff]  }
  0xa5   :  { %1562 = vmatprep.subr.bf16.mxu0 %v3016_v33  ;;  %v3103_v33 = vld [vmem:[#allocation5 + $0x28c] ss:$16 sps:$4 sm:$0xff]  }
  0xa7   :  { %1645 = vmatpush1.bf16.msra.mxu1 %v3017_v38  ;;  %v3104_v38 = vld [vmem:[#allocation5 + $0x6a0] ss:$16 sps:$4 sm:$0xff]  }
  0xa8   :  { %1563 = vmatpush1.bf16.msra.mxu0 %v3014_v36  ;;  %1646 = vmatprep.subr.bf16.mxu1 %v3025_v40  ;;  %v3109_v36 = vld [vmem:[#allocation5 + $0x2ac] ss:$16 sps:$4 sm:$0xff]   ;;  %v3112_v40 = vld [vmem:[#allocation5 + $0x6c4] ss:$16 sps:$4 sm:$0xff]  }
  0xa9   :  { %1564 = vmatprep.subr.bf16.mxu0 %v3022_v39  ;;  %v3107_v39 = vld [vmem:[#allocation5 + $0x2a8] ss:$16 sps:$4 sm:$0xff]  }
  0xab   :  { %1647 = vmatpush1.bf16.msra.mxu1 %v3023_v42  ;;  %v3110_v42 = vld [vmem:[#allocation5 + $0x6c0] ss:$16 sps:$4 sm:$0xff]  }
  0xac   :  { %1565 = vmatpush1.bf16.msra.mxu0 %v3020_v41  ;;  %1648 = vmatprep.subr.bf16.mxu1 %v3031_v44  ;;  %v3115_v41 = vld [vmem:[#allocation5 + $0x2cc] ss:$16 sps:$4 sm:$0xff]   ;;  %v3118_v44 = vld [vmem:[#allocation5 + $0x6e4] ss:$16 sps:$4 sm:$0xff]  }
  0xad   :  { %1566 = vmatprep.subr.bf16.mxu0 %v3028_v43  ;;  %v3113_v43 = vld [vmem:[#allocation5 + $0x2c8] ss:$16 sps:$4 sm:$0xff]  }
  0xaf   :  { %1649 = vmatpush1.bf16.msra.mxu1 %v3029_v46  ;;  %v3116_v46 = vld [vmem:[#allocation5 + $0x6e0] ss:$16 sps:$4 sm:$0xff]  }
  0xb0   :  { %1567 = vmatpush1.bf16.msra.mxu0 %v3026_v45  ;;  %1650 = vmatprep.subr.bf16.mxu1 %v3037_v48  ;;  %v3121_v45 = vld [vmem:[#allocation5 + $0x2ec] ss:$16 sps:$4 sm:$0xff]  }
  0xb1   :  { %1568 = vmatprep.subr.bf16.mxu0 %v3034_v47  ;;  %v3119_v47 = vld [vmem:[#allocation5 + $0x2e8] ss:$16 sps:$4 sm:$0xff]  }
  0xb2   :  { %v94_v48 = vld [vmem:[#allocation3 + $0x30] sm:$0xff] }
  0xb3   :  { %1651 = vmatpush1.bf16.msra.mxu1 %v3035_v50  ;;  %v3122_v50 = vld [vmem:[#allocation5 + $0x308] ss:$16 sps:$4 sm:$0xff]  }
  0xb4   :  { %1569 = vmatpush1.bf16.msra.mxu0 %v3032_v49  ;;  %1652 = vmatprep.subr.bf16.mxu1 %v3043_v52  ;;  %v3124_v49 = vld [vmem:[#allocation5 + $0x30c] ss:$16 sps:$4 sm:$0xff]  }
  0xb5   :  { %1570 = vmatprep.subr.bf16.mxu0 %v3040_v51  ;;  %v3562_v51 = vpack.c.bf16 %v94_v48, %v94_v48  ;;  %v3127_v52 = vld [vmem:[#allocation5 + $0x32c] ss:$16 sps:$4 sm:$0xff]  }
  0xb6   :  { %v3172_v48 = vld [vmem:[#allocation5 + $0x50c] ss:$16 sps:$4 sm:$0xff]  }
  0xb7   :  { %1653 = vmatpush1.bf16.msra.mxu1 %v3041_v55  ;;  %v3220_v55 = vld [vmem:[#allocation7 + $0x4] ss:$8 sps:$4 sm:$0xff]  }
  0xb8   :  { %1571 = vmatpush1.bf16.msra.mxu0 %v3038_v54  ;;  %1654 = vmatprep.subr.bf16.mxu1 %v3049_v57  ;;  %v3218_v54 = vld [vmem:[#allocation7] ss:$8 sps:$4 sm:$0xff]   ;;  %v3223_v57 = vld [vmem:[#allocation7 + $0x14] ss:$8 sps:$4 sm:$0xff]  }
  0xb9   :  { %1572 = vmatprep.subr.bf16.mxu0 %v3046_v56  ;;  %v3125_v56 = vld [vmem:[#allocation5 + $0x328] ss:$16 sps:$4 sm:$0xff]  }
  0xbb   :  { %1655 = vmatpush1.bf16.msra.mxu1 %v3047_v59  ;;  %v3221_v59 = vld [vmem:[#allocation7 + $0x10] ss:$8 sps:$4 sm:$0xff]  }
  0xbc   :  { %1573 = vmatpush1.bf16.msra.mxu0 %v3044_v58  ;;  %1656 = vmatprep.subr.bf16.mxu1 %v3055_v61  ;;  %v3130_v58 = vld [vmem:[#allocation5 + $0x34c] ss:$16 sps:$4 sm:$0xff]   ;;  %v3128_v61 = vld [vmem:[#allocation5 + $0x348] ss:$16 sps:$4 sm:$0xff]  }
  0xbd   :  { %1574 = vmatprep.subr.bf16.mxu0 %v3052_v60  ;;  %v3226_v60 = vld [vmem:[#allocation7 + $0x24] ss:$8 sps:$4 sm:$0xff]  }
  0xbf   :  { %1657 = vmatpush1.bf16.msra.mxu1 %v3053_v63  ;;  %v3224_v63 = vld [vmem:[#allocation7 + $0x20] ss:$8 sps:$4 sm:$0xff]  }
  0xc0   :  { %1575 = vmatpush1.bf16.msra.mxu0 %v3050_v62  ;;  %1658 = vmatprep.subr.bf16.mxu1 %v3061_v1  ;;  %v3133_v62 = vld [vmem:[#allocation5 + $0x36c] ss:$16 sps:$4 sm:$0xff]  }
  0xc1   :  { %1576 = vmatprep.subr.bf16.mxu0 %v3058_v0  ;;  %v3131_v0 = vld [vmem:[#allocation5 + $0x368] ss:$16 sps:$4 sm:$0xff]   ;;  %v3136_v1 = vld [vmem:[#allocation5 + $0x38c] ss:$16 sps:$4 sm:$0xff]  }
  0xc3   :  { %1659 = vmatpush1.bf16.msra.mxu1 %v3059_v3  ;;  %v3227_v3 = vld [vmem:[#allocation7 + $0x30] ss:$8 sps:$4 sm:$0xff]  }
  0xc4   :  { %1577 = vmatpush1.bf16.msra.mxu0 %v3056_v2  ;;  %1660 = vmatprep.subr.bf16.mxu1 %v3067_v5  ;;  %v3229_v2 = vld [vmem:[#allocation7 + $0x34] ss:$8 sps:$4 sm:$0xff]   ;;  %v3134_v5 = vld [vmem:[#allocation5 + $0x388] ss:$16 sps:$4 sm:$0xff]  }
  0xc5   :  { %1578 = vmatprep.subr.bf16.mxu0 %v3064_v4  ;;  %v3232_v4 = vld [vmem:[#allocation7 + $0x44] ss:$8 sps:$4 sm:$0xff]  }
  0xc7   :  { %1661 = vmatpush1.bf16.msra.mxu1 %v3065_v7  ;;  %v3230_v7 = vld [vmem:[#allocation7 + $0x40] ss:$8 sps:$4 sm:$0xff]  }
  0xc8   :  { %1579 = vmatpush1.bf16.msra.mxu0 %v3062_v6  ;;  %1662 = vmatprep.subr.bf16.mxu1 %v3073_v10  ;;  %v3139_v6 = vld [vmem:[#allocation5 + $0x3ac] ss:$16 sps:$4 sm:$0xff]   ;;  %v3137_v10 = vld [vmem:[#allocation5 + $0x3a8] ss:$16 sps:$4 sm:$0xff]  }
  0xc9   :  { %1580 = vmatprep.subr.bf16.mxu0 %v3070_v8  ;;  %v3235_v8 = vld [vmem:[#allocation7 + $0x54] ss:$8 sps:$4 sm:$0xff]  }
  0xcb   :  { %1663 = vmatpush1.bf16.msra.mxu1 %v3071_v13  ;;  %v3233_v13 = vld [vmem:[#allocation7 + $0x50] ss:$8 sps:$4 sm:$0xff]  }
  0xcc   :  { %1581 = vmatpush1.bf16.msra.mxu0 %v3068_v11  ;;  %1673 = vmatprep.subr.bf16.mxu1 %v3079_v16  ;;  %v3142_v11 = vld [vmem:[#allocation5 + $0x3cc] ss:$16 sps:$4 sm:$0xff]  }
  0xcd   :  { %1591 = vmatprep.subr.bf16.mxu0 %v3076_v14  ;;  %v3238_v14 = vld [vmem:[#allocation7 + $0x64] ss:$8 sps:$4 sm:$0xff]  }
  0xce   :  { %1665 = vmatmul.mubr.bf16.vlgmr.msra.gmra.mrb[4].mxu1 %v3546_v9  ;;  %v3097_v9 = vld [vmem:[#allocation5 + $0x26c] ss:$16 sps:$4 sm:$0xff]  }
  0xcf   :  { %1583 = vmatmul.mubr.bf16.vlgmr.msra.gmra.mrb[0].mxu0 %v3556_v18  ;;  %1674 = vmatpush1.bf16.msra.mxu1 %v3077_v19  ;;  %v3145_v16 = vld [vmem:[#allocation5 + $0x3ec] ss:$16 sps:$4 sm:$0xff]  }
  0xd0   :  { %1592 = vmatpush1.bf16.msra.mxu0 %v3074_v17  ;;  %1675 = vmatprep.subr.bf16.mxu1 %v3085_v21  ;;  %v3236_v17 = vld [vmem:[#allocation7 + $0x60] ss:$8 sps:$4 sm:$0xff]   ;;  %v3241_v19 = vld [vmem:[#allocation7 + $0x74] ss:$8 sps:$4 sm:$0xff]  }
  0xd1   :  { %1593 = vmatprep.subr.bf16.mxu0 %v3082_v20  ;;  %1623 = vmatprep.mubr.bf16.mxu0 %v3438_v26  ;;  %v3143_v20 = vld [vmem:[#allocation5 + $0x3e8] ss:$16 sps:$4 sm:$0xff]   ;;  %v3148_v21 = vld [vmem:[#allocation5 + $0x40c] ss:$16 sps:$4 sm:$0xff]  }
  0xd2   :  { %1705 = vmatprep.mubr.bf16.mxu1 %v3542_v53  ;;  %v3101_v53 = vld [vmem:[#allocation5 + $0x288] ss:$16 sps:$4 sm:$0xff]  }
  0xd3   :  { %1676 = vmatpush1.bf16.msra.mxu1 %v3083_v23  ;;  %v3244_v23 = vld [vmem:[#allocation7 + $0x84] ss:$8 sps:$4 sm:$0xff]  }
  0xd4   :  { %1594 = vmatpush1.bf16.msra.mxu0 %v3080_v22  ;;  %1677 = vmatprep.subr.bf16.mxu1 %v3091_v25  ;;  %v3239_v22 = vld [vmem:[#allocation7 + $0x70] ss:$8 sps:$4 sm:$0xff]   ;;  %v3151_v25 = vld [vmem:[#allocation5 + $0x42c] ss:$16 sps:$4 sm:$0xff]  }
  0xd5   :  { %1595 = vmatprep.subr.bf16.mxu0 %v3088_v24  ;;  %v3146_v24 = vld [vmem:[#allocation5 + $0x408] ss:$16 sps:$4 sm:$0xff]  }
  0xd7   :  { %1678 = vmatpush1.bf16.msra.mxu1 %v3089_v28  ;;  %v3247_v28 = vld [vmem:[#allocation7 + $0x94] ss:$8 sps:$4 sm:$0xff]  }
  0xd8   :  { %1596 = vmatpush1.bf16.msra.mxu0 %v3086_v27  ;;  %1679 = vmatprep.subr.bf16.mxu1 %v3097_v9  ;;  %v3242_v27 = vld [vmem:[#allocation7 + $0x80] ss:$8 sps:$4 sm:$0xff]   ;;  %v3154_v9 = vld [vmem:[#allocation5 + $0x44c] ss:$16 sps:$4 sm:$0xff]  }
  0xd9   :  { %1597 = vmatprep.subr.bf16.mxu0 %v3094_v29  ;;  %v3149_v29 = vld [vmem:[#allocation5 + $0x428] ss:$16 sps:$4 sm:$0xff]  }
  0xdb   :  { %1680 = vmatpush1.bf16.msra.mxu1 %v3095_v31  ;;  %v3250_v31 = vld [vmem:[#allocation7 + $0xa4] ss:$8 sps:$4 sm:$0xff]  }
  0xdc   :  { %1598 = vmatpush1.bf16.msra.mxu0 %v3092_v30  ;;  %1681 = vmatprep.subr.bf16.mxu1 %v3103_v33  ;;  %v3245_v30 = vld [vmem:[#allocation7 + $0x90] ss:$8 sps:$4 sm:$0xff]   ;;  %v3157_v33 = vld [vmem:[#allocation5 + $0x46c] ss:$16 sps:$4 sm:$0xff]  }
  0xdd   :  { %1599 = vmatprep.subr.bf16.mxu0 %v3100_v32  ;;  %v3152_v32 = vld [vmem:[#allocation5 + $0x448] ss:$16 sps:$4 sm:$0xff]  }
  0xdf   :  { %1682 = vmatpush1.bf16.msra.mxu1 %v3101_v53  ;;  %v3155_v53 = vld [vmem:[#allocation5 + $0x468] ss:$16 sps:$4 sm:$0xff]  }
  0xe0   :  { %1600 = vmatpush1.bf16.msra.mxu0 %v3098_v34  ;;  %1683 = vmatprep.subr.bf16.mxu1 %v3109_v36  ;;  %v3248_v34 = vld [vmem:[#allocation7 + $0xa0] ss:$8 sps:$4 sm:$0xff]   ;;  %v3256_v36 = vld [vmem:[#allocation7 + $0xc4] ss:$8 sps:$4 sm:$0xff]  }
  0xe1   :  { %1601 = vmatprep.subr.bf16.mxu0 %v3106_v35  ;;  %v3160_v35 = vld [vmem:[#allocation5 + $0x48c] ss:$16 sps:$4 sm:$0xff]  }
  0xe3   :  { %1684 = vmatpush1.bf16.msra.mxu1 %v3107_v39  ;;  %v3163_v39 = vld [vmem:[#allocation5 + $0x4ac] ss:$16 sps:$4 sm:$0xff]  }
  0xe4   :  { %1602 = vmatpush1.bf16.msra.mxu0 %v3104_v38  ;;  %1685 = vmatprep.subr.bf16.mxu1 %v3115_v41  ;;  %v3158_v38 = vld [vmem:[#allocation5 + $0x488] ss:$16 sps:$4 sm:$0xff]   ;;  %v3259_v41 = vld [vmem:[#allocation7 + $0xd4] ss:$8 sps:$4 sm:$0xff]  }
  0xe5   :  { %1603 = vmatprep.subr.bf16.mxu0 %v3112_v40  ;;  %v3254_v40 = vld [vmem:[#allocation7 + $0xc0] ss:$8 sps:$4 sm:$0xff]  }
  0xe7   :  { %1686 = vmatpush1.bf16.msra.mxu1 %v3113_v43  ;;  %v3166_v43 = vld [vmem:[#allocation5 + $0x4cc] ss:$16 sps:$4 sm:$0xff]  }
  0xe8   :  { %1604 = vmatpush1.bf16.msra.mxu0 %v3110_v42  ;;  %1687 = vmatprep.subr.bf16.mxu1 %v3121_v45  ;;  %v3161_v42 = vld [vmem:[#allocation5 + $0x4a8] ss:$16 sps:$4 sm:$0xff]  }
  0xe9   :  { %1605 = vmatprep.subr.bf16.mxu0 %v3118_v44  ;;  %v3257_v44 = vld [vmem:[#allocation7 + $0xd0] ss:$8 sps:$4 sm:$0xff]  }
  0xea   :  { %v3164_v45 = vld [vmem:[#allocation5 + $0x4c8] ss:$16 sps:$4 sm:$0xff]  }
  0xeb   :  { %1688 = vmatpush1.bf16.msra.mxu1 %v3119_v47  ;;  %v3167_v47 = vld [vmem:[#allocation5 + $0x4e8] ss:$16 sps:$4 sm:$0xff]  }
  0xec   :  { %1606 = vmatpush1.bf16.msra.mxu0 %v3116_v46  ;;  %1689 = vmatprep.subr.bf16.mxu1 %v3124_v49  ;;  %v3169_v46 = vld [vmem:[#allocation5 + $0x4ec] ss:$16 sps:$4 sm:$0xff]   ;;  %v3170_v49 = vld [vmem:[#allocation5 + $0x508] ss:$16 sps:$4 sm:$0xff]  }
  0xed   :  { %2208 = vmatprep.subr.bf16.mxu0 %v3220_v55  ;;  %v3176_v55 = vld [vmem:[#allocation5 + $0x548] ss:$16 sps:$4 sm:$0xff]  }
  0xef   :  { %1624 = vmatmul.mubr.bf16.vlgmr.msra.gmra.mrb[0].mxu0 %v3562_v51  ;;  %1690 = vmatpush1.bf16.msra.mxu1 %v3122_v50  ;;  %v3175_v50 = vld [vmem:[#allocation5 + $0x52c] ss:$16 sps:$4 sm:$0xff]  }
  0xf0   :  { %1691 = vmatprep.subr.bf16.mxu1 %v3127_v52  ;;  %2209 = vmatpush1.bf16.msra.mxu0 %v3218_v54  ;;  %v3173_v52 = vld [vmem:[#allocation5 + $0x528] ss:$16 sps:$4 sm:$0xff]   ;;  %v3178_v54 = vld [vmem:[#allocation5 + $0x54c] ss:$16 sps:$4 sm:$0xff]  }
  0xf1   :  { %2210 = vmatprep.subr.bf16.mxu0 %v3223_v57  ;;  %v3179_v57 = vld [vmem:[#allocation5 + $0x568] ss:$16 sps:$4 sm:$0xff]  }
  0xf3   :  { %1692 = vmatpush1.bf16.msra.mxu1 %v3125_v56  ;;  %v3181_v56 = vld [vmem:[#allocation5 + $0x56c] ss:$16 sps:$4 sm:$0xff]  }
  0xf4   :  { %1693 = vmatprep.subr.bf16.mxu1 %v3130_v58  ;;  %2211 = vmatpush1.bf16.msra.mxu0 %v3221_v59  ;;  %v3184_v58 = vld [vmem:[#allocation5 + $0x58c] ss:$16 sps:$4 sm:$0xff]   ;;  %v3182_v59 = vld [vmem:[#allocation5 + $0x588] ss:$16 sps:$4 sm:$0xff]  }
  0xf5   :  { %2212 = vmatprep.subr.bf16.mxu0 %v3226_v60  ;;  %v3187_v60 = vld [vmem:[#allocation5 + $0x5ac] ss:$16 sps:$4 sm:$0xff]  }
  0xf7   :  { %1694 = vmatpush1.bf16.msra.mxu1 %v3128_v61  ;;  %v3185_v61 = vld [vmem:[#allocation5 + $0x5a8] ss:$16 sps:$4 sm:$0xff]  }
  0xf8   :  { %1695 = vmatprep.subr.bf16.mxu1 %v3133_v62  ;;  %2213 = vmatpush1.bf16.msra.mxu0 %v3224_v63  ;;  %v3190_v62 = vld [vmem:[#allocation5 + $0x5cc] ss:$16 sps:$4 sm:$0xff]  }
  0xf9   :  { %2214 = vmatprep.subr.bf16.mxu0 %v3229_v2  ;;  %v3262_v63 = vld [vmem:[#allocation7 + $0xe4] ss:$8 sps:$4 sm:$0xff]  }
  0xfa   :  { %v3193_v2 = vld [vmem:[#allocation5 + $0x5ec] ss:$16 sps:$4 sm:$0xff]  }
  0xfb   :  { %1696 = vmatpush1.bf16.msra.mxu1 %v3131_v0  ;;  %v3260_v0 = vld [vmem:[#allocation7 + $0xe0] ss:$8 sps:$4 sm:$0xff]  }
  0xfc   :  { %1697 = vmatprep.subr.bf16.mxu1 %v3136_v1  ;;  %2215 = vmatpush1.bf16.msra.mxu0 %v3227_v3  ;;  %v3188_v1 = vld [vmem:[#allocation5 + $0x5c8] ss:$16 sps:$4 sm:$0xff]   ;;  %v3265_v3 = vld [vmem:[#allocation7 + $0xf4] ss:$8 sps:$4 sm:$0xff]  }
  0xfd   :  { %2216 = vmatprep.subr.bf16.mxu0 %v3232_v4  ;;  %v3263_v4 = vld [vmem:[#allocation7 + $0xf0] ss:$8 sps:$4 sm:$0xff]  }
  0xff   :  { %1698 = vmatpush1.bf16.msra.mxu1 %v3134_v5  ;;  %v3191_v5 = vld [vmem:[#allocation5 + $0x5e8] ss:$16 sps:$4 sm:$0xff]  }
 0x100   :  { %1699 = vmatprep.subr.bf16.mxu1 %v3139_v6  ;;  %2217 = vmatpush1.bf16.msra.mxu0 %v3230_v7  ;;  %v3196_v6 = vld [vmem:[#allocation5 + $0x60c] ss:$16 sps:$4 sm:$0xff]   ;;  %v3194_v7 = vld [vmem:[#allocation5 + $0x608] ss:$16 sps:$4 sm:$0xff]  }
 0x101   :  { %2218 = vmatprep.subr.bf16.mxu0 %v3235_v8  ;;  %v3268_v8 = vld [vmem:[#allocation7 + $0x104] ss:$8 sps:$4 sm:$0xff]  }
 0x103   :  { %1700 = vmatpush1.bf16.msra.mxu1 %v3137_v10  ;;  %v3199_v10 = vld [vmem:[#allocation5 + $0x62c] ss:$16 sps:$4 sm:$0xff]  }
 0x104   :  { %1701 = vmatprep.subr.bf16.mxu1 %v3142_v11  ;;  %2219 = vmatpush1.bf16.msra.mxu0 %v3233_v13  ;;  %v3197_v11 = vld [vmem:[#allocation5 + $0x628] ss:$16 sps:$4 sm:$0xff]   ;;  %v3202_v13 = vld [vmem:[#allocation5 + $0x64c] ss:$16 sps:$4 sm:$0xff]  }
 0x105   :  { %2220 = vmatprep.subr.bf16.mxu0 %v3238_v14  ;;  %v3200_v14 = vld [vmem:[#allocation5 + $0x648] ss:$16 sps:$4 sm:$0xff]  }
 0x107   :  { %1702 = vmatpush1.bf16.msra.mxu1 %v3140_v15  ;;  %v3205_v15 = vld [vmem:[#allocation5 + $0x66c] ss:$16 sps:$4 sm:$0xff]  }
 0x108   :  { %1703 = vmatprep.subr.bf16.mxu1 %v3145_v16  ;;  %2221 = vmatpush1.bf16.msra.mxu0 %v3236_v17  ;;  %v3203_v16 = vld [vmem:[#allocation5 + $0x668] ss:$16 sps:$4 sm:$0xff]   ;;  %v3208_v17 = vld [vmem:[#allocation5 + $0x68c] ss:$16 sps:$4 sm:$0xff]  }
 0x109   :  { %2222 = vmatprep.subr.bf16.mxu0 %v3241_v19  ;;  %v3206_v19 = vld [vmem:[#allocation5 + $0x688] ss:$16 sps:$4 sm:$0xff]  }
 0x10b   :  { %1704 = vmatpush1.bf16.msra.mxu1 %v3143_v20  ;;  %v3211_v20 = vld [vmem:[#allocation5 + $0x6ac] ss:$16 sps:$4 sm:$0xff]  }
 0x10c   :  { %1714 = vmatprep.subr.bf16.mxu1 %v3148_v21  ;;  %2223 = vmatpush1.bf16.msra.mxu0 %v3239_v22  ;;  %v3214_v21 = vld [vmem:[#allocation5 + $0x6cc] ss:$16 sps:$4 sm:$0xff]  }
 0x10d   :  { %2224 = vmatprep.subr.bf16.mxu0 %v3244_v23 }
 0x10e   :  { %1706 = vmatmul.mubr.bf16.vlgmr.msra.gmra.mrb[4].mxu1 %v3548_v12  ;;  %v3253_v12 = vld [vmem:[#allocation7 + $0xb4] ss:$8 sps:$4 sm:$0xff]  }
 0x10f   :  { %1715 = vmatpush1.bf16.msra.mxu1 %v3146_v24  ;;  %1746 = vmatprep.mubr.bf16.mxu1 %v3553_v37  ;;  %v3251_v37 = vld [vmem:[#allocation7 + $0xb0] ss:$8 sps:$4 sm:$0xff]  }
 0x110   :  { %1716 = vmatprep.subr.bf16.mxu1 %v3151_v25  ;;  %2225 = vmatpush1.bf16.msra.mxu0 %v3242_v27  ;;  %v3212_v24 = vld [vmem:[#allocation5 + $0x6c8] ss:$16 sps:$4 sm:$0xff]   ;;  %v3217_v27 = vld [vmem:[#allocation5 + $0x6ec] ss:$16 sps:$4 sm:$0xff]  }
 0x111   :  { %2226 = vmatprep.subr.bf16.mxu0 %v3247_v28  ;;  %v3215_v28 = vld [vmem:[#allocation5 + $0x6e8] ss:$16 sps:$4 sm:$0xff]  }
 0x113   :  { %1717 = vmatpush1.bf16.msra.mxu1 %v3149_v29  ;;  %v328_v29 = vlaneseq }
 0x114   :  { %1718 = vmatprep.subr.bf16.mxu1 %v3154_v9  ;;  %2227 = vmatpush1.bf16.msra.mxu0 %v3245_v30 }
 0x115   :  { %2228 = vmatprep.subr.bf16.mxu0 %v3250_v31  ;;  %v3570_v9 = vshrl.u32 %v328_v29, 7  ;;  %v3576_v31 = vld [vmem:[%s3607_s2] sm:$0xf] }
 0x117   :  { %1719 = vmatpush1.bf16.msra.mxu1 %v3152_v32  ;;  %v330_v30 = vsub.s32 0, %v3570_v9  ;;  %v334_v32 = vsub.s32 1, %v3570_v9  ;;  %v338_v29 = vsub.s32 2, %v3570_v9 }
 0x118   :  { %1720 = vmatprep.subr.bf16.mxu1 %v3157_v33  ;;  %2229 = vmatpush1.bf16.msra.mxu0 %v3248_v34 }
 0x119   :  { %2230 = vmatprep.subr.bf16.mxu0 %v3253_v12  ;;  %v331_v33 = vrot.slane %v3576_v31, %v330_v30 }
 0x11b   :  { %1721 = vmatpush1.bf16.msra.mxu1 %v3155_v53 }
 0x11c   :  { %1722 = vmatprep.subr.bf16.mxu1 %v3160_v35  ;;  %2231 = vmatpush1.bf16.msra.mxu0 %v3251_v37 }
 0x11d   :  { %2232 = vmatprep.subr.bf16.mxu0 %v3256_v36 }
 0x11f   :  { %1723 = vmatpush1.bf16.msra.mxu1 %v3158_v38 }
 0x120   :  { %1724 = vmatprep.subr.bf16.mxu1 %v3163_v39  ;;  %2233 = vmatpush1.bf16.msra.mxu0 %v3254_v40 }
 0x121   :  { %2234 = vmatprep.subr.bf16.mxu0 %v3259_v41 }
 0x123   :  { %1725 = vmatpush1.bf16.msra.mxu1 %v3161_v42 }
 0x124   :  { %1726 = vmatprep.subr.bf16.mxu1 %v3166_v43  ;;  %2235 = vmatpush1.bf16.msra.mxu0 %v3257_v44 }
 0x125   :  { %2236 = vmatprep.subr.bf16.mxu0 %v3262_v63  ;;  %v3321_v63 = vld [vmem:[#allocation8 + $0x18] sm:$0xff]  }
 0x127   :  { %1727 = vmatpush1.bf16.msra.mxu1 %v3164_v45  ;;  %v3266_v45 = vld [vmem:[#allocation7 + $0x100] ss:$8 sps:$4 sm:$0xff]  }
 0x128   :  { %1728 = vmatprep.subr.bf16.mxu1 %v3169_v46  ;;  %2237 = vmatpush1.bf16.msra.mxu0 %v3260_v0  ;;  %v3322_v0 = vld [vmem:[#allocation8 + $0x60] sm:$0xff]  }
 0x129   :  { %2238 = vmatprep.subr.bf16.mxu0 %v3265_v3  ;;  %v3323_v3 = vld [vmem:[#allocation8 + $0x20] sm:$0xff]  }
 0x12b   :  { %1729 = vmatpush1.bf16.msra.mxu1 %v3167_v47  ;;  %v3271_v47 = vld [vmem:[#allocation7 + $0x114] ss:$8 sps:$4 sm:$0xff]  }
 0x12c   :  { %1730 = vmatprep.subr.bf16.mxu1 %v3172_v48  ;;  %2239 = vmatpush1.bf16.msra.mxu0 %v3263_v4  ;;  %v3314_v48 = vld [vmem:[#allocation8 + $0x40] sm:$0xff]   ;;  %v3324_v4 = vld [vmem:[#allocation8 + $0x68] sm:$0xff]  }
 0x12d   :  { %2249 = vmatprep.subr.bf16.mxu0 %v3268_v8  ;;  %v3284_v8 = vld [vmem:[#allocation7 + $0x160] ss:$8 sps:$4 sm:$0xff]  }
 0x12f   :  { %1731 = vmatpush1.bf16.msra.mxu1 %v3170_v49  ;;  %v3315_v49 = vld [vmem:[#allocation8] sm:$0xff]  }
 0x130   :  { %1732 = vmatprep.subr.bf16.mxu1 %v3175_v50  ;;  %v3316_v50 = vld [vmem:[#allocation8 + $0x48] sm:$0xff]  }
 0x133   :  { %1733 = vmatpush1.bf16.msra.mxu1 %v3173_v52  ;;  %v3269_v52 = vld [vmem:[#allocation7 + $0x110] ss:$8 sps:$4 sm:$0xff]  }
 0x134   :  { %1734 = vmatprep.subr.bf16.mxu1 %v3178_v54  ;;  %v3274_v54 = vld [vmem:[#allocation7 + $0x124] ss:$8 sps:$4 sm:$0xff]  }
 0x137   :  { %1735 = vmatpush1.bf16.msra.mxu1 %v3176_v55  ;;  %v3317_v55 = vld [vmem:[#allocation8 + $0x8] sm:$0xff]  }
 0x138   :  { %1736 = vmatprep.subr.bf16.mxu1 %v3181_v56  ;;  %v3318_v56 = vld [vmem:[#allocation8 + $0x50] sm:$0xff]  }
 0x13b   :  { %1737 = vmatpush1.bf16.msra.mxu1 %v3179_v57  ;;  %v3272_v57 = vld [vmem:[#allocation7 + $0x120] ss:$8 sps:$4 sm:$0xff]  }
 0x13c   :  { %1738 = vmatprep.subr.bf16.mxu1 %v3184_v58  ;;  %v3277_v58 = vld [vmem:[#allocation7 + $0x134] ss:$8 sps:$4 sm:$0xff]  }
 0x13f   :  { %1739 = vmatpush1.bf16.msra.mxu1 %v3182_v59  ;;  %v3319_v59 = vld [vmem:[#allocation8 + $0x10] sm:$0xff]  }
 0x140   :  { %1740 = vmatprep.subr.bf16.mxu1 %v3187_v60  ;;  %v3320_v60 = vld [vmem:[#allocation8 + $0x58] sm:$0xff]  }
 0x143   :  { %1741 = vmatpush1.bf16.msra.mxu1 %v3185_v61  ;;  %v3275_v61 = vld [vmem:[#allocation7 + $0x130] ss:$8 sps:$4 sm:$0xff]  }
 0x144   :  { %1742 = vmatprep.subr.bf16.mxu1 %v3190_v62  ;;  %v3280_v62 = vld [vmem:[#allocation7 + $0x144] ss:$8 sps:$4 sm:$0xff]  }
 0x147   :  { %1743 = vmatpush1.bf16.msra.mxu1 %v3188_v1  ;;  %v3278_v1 = vld [vmem:[#allocation7 + $0x140] ss:$8 sps:$4 sm:$0xff]  }
 0x148   :  { %1744 = vmatprep.subr.bf16.mxu1 %v3193_v2  ;;  %v3283_v2 = vld [vmem:[#allocation7 + $0x154] ss:$8 sps:$4 sm:$0xff]  }
 0x14b   :  { %1745 = vmatpush1.bf16.msra.mxu1 %v3191_v5  ;;  %v3281_v5 = vld [vmem:[#allocation7 + $0x150] ss:$8 sps:$4 sm:$0xff]  }
 0x14c   :  { %1755 = vmatprep.subr.bf16.mxu1 %v3196_v6  ;;  %v3286_v6 = vld [vmem:[#allocation7 + $0x164] ss:$8 sps:$4 sm:$0xff]  }
 0x14e   :  { %1747 = vmatmul.mubr.bf16.vlgmr.msra.gmra.mrb[4].mxu1 %v3556_v18  ;;  %v3209_v18 = vld [vmem:[#allocation5 + $0x6a8] ss:$16 sps:$4 sm:$0xff]  }
 0x14f   :  { %1756 = vmatpush1.bf16.msra.mxu1 %v3194_v7  ;;  %1787 = vmatprep.mubr.bf16.mxu1 %v3438_v26  ;;  %v3325_v7 = vld [vmem:[#allocation8 + $0x28] sm:$0xff]  }
 0x150   :  { %1757 = vmatprep.subr.bf16.mxu1 %v3199_v10  ;;  %v3289_v10 = vld [vmem:[#allocation7 + $0x174] ss:$8 sps:$4 sm:$0xff]  }
 0x153   :  { %1758 = vmatpush1.bf16.msra.mxu1 %v3197_v11  ;;  %v3287_v11 = vld [vmem:[#allocation7 + $0x170] ss:$8 sps:$4 sm:$0xff]  }
 0x154   :  { %1759 = vmatprep.subr.bf16.mxu1 %v3202_v13  ;;  %v3292_v13 = vld [vmem:[#allocation7 + $0x184] ss:$8 sps:$4 sm:$0xff]  }
 0x157   :  { %1760 = vmatpush1.bf16.msra.mxu1 %v3200_v14  ;;  %v3290_v14 = vld [vmem:[#allocation7 + $0x180] ss:$8 sps:$4 sm:$0xff]  }
 0x158   :  { %1761 = vmatprep.subr.bf16.mxu1 %v3205_v15  ;;  %v3295_v15 = vld [vmem:[#allocation7 + $0x194] ss:$8 sps:$4 sm:$0xff]  }
 0x15b   :  { %1762 = vmatpush1.bf16.msra.mxu1 %v3203_v16  ;;  %v3293_v16 = vld [vmem:[#allocation7 + $0x190] ss:$8 sps:$4 sm:$0xff]  }
 0x15c   :  { %1763 = vmatprep.subr.bf16.mxu1 %v3208_v17  ;;  %v3298_v17 = vld [vmem:[#allocation7 + $0x1a4] ss:$8 sps:$4 sm:$0xff]  }
 0x15f   :  { %1764 = vmatpush1.bf16.msra.mxu1 %v3206_v19  ;;  %v3296_v19 = vld [vmem:[#allocation7 + $0x1a0] ss:$8 sps:$4 sm:$0xff]  }
 0x160   :  { %1765 = vmatprep.subr.bf16.mxu1 %v3211_v20  ;;  %v3301_v20 = vld [vmem:[#allocation7 + $0x1b4] ss:$8 sps:$4 sm:$0xff]  }
 0x161   :  { %v1502_v22 = vpop.f32.mrb[0].mxu1 }
 0x162   :  { %v1504_v26 = vpop.f32.mrb[1].mxu1  ;;  %v1503_v34 = vadd.f32 %v1502_v22, %v331_v33  ;;  %v3302_v22 = vld [vmem:[#allocation7 + $0x1c0] ss:$8 sps:$4 sm:$0xff]   ;;  %v342_v33 = vsub.s32 3, %v3570_v9  ;;  %v2797_v9 = vld [vmem:[%s3611_s6] ss:$0 sm:$0xff] }
 0x163   :  { %v1506_v23 = vpop.f32.mrb[2].mxu1  ;;  %1766 = vmatpush1.bf16.msra.mxu1 %v3209_v18  ;;  %v3299_v18 = vld [vmem:[#allocation7 + $0x1b0] ss:$8 sps:$4 sm:$0xff]  }
 0x164   :  { %v1507_v25 = vpop.f32.mrb[3].mxu1  ;;  %1767 = vmatprep.subr.bf16.mxu1 %v3214_v21  ;;  %v3304_v21 = vld [vmem:[#allocation7 + $0x1c4] ss:$8 sps:$4 sm:$0xff]   ;;  %v3305_v23 = vld [vmem:[#allocation7 + $0x1d0] ss:$8 sps:$4 sm:$0xff]  }
 0x165   :  { %v3308_v25 = vld [vmem:[#allocation7 + $0x1e0] ss:$8 sps:$4 sm:$0xff]  }
 0x167   :  { %1768 = vmatpush1.bf16.msra.mxu1 %v3212_v24  ;;  %v3310_v24 = vld [vmem:[#allocation7 + $0x1e4] ss:$8 sps:$4 sm:$0xff]  }
 0x168   :  { %1769 = vmatprep.subr.bf16.mxu1 %v3217_v27  ;;  %v3313_v27 = vld [vmem:[#allocation7 + $0x1f4] ss:$8 sps:$4 sm:$0xff]  }
 0x16b   :  { %1770 = vmatpush1.bf16.msra.mxu1 %v3215_v28  ;;  %v3311_v28 = vld [vmem:[#allocation7 + $0x1f0] ss:$8 sps:$4 sm:$0xff]  }
 0x16c   :  { %2817 = vmatprep.subr.bf16.mxu1 %v3314_v48  ;;  %v1876_v48 = vld [vmem:[%s3609_s4] sm:$0x3] }
 0x16e   :  { %1788 = vmatmul.mubr.bf16.vlgmr.msra.gmra.mrb[4].mxu1 %v3562_v51  ;;  %v335_v51 = vrot.slane %v3576_v31, %v334_v32 }
 0x16f   :  { %2818 = vmatpush3.bf16.msra.mxu1 %v3315_v49  ;;  %v1881_v49 = vrot.slane %v1876_v48, %v330_v30 }
 0x170   :  { %v1505_v12 = vadd.f32 %v1504_v26, %v335_v51  ;;  %2819 = vmatprep.subr.bf16.mxu1 %v3316_v50  ;;  %v3307_v26 = vld [vmem:[#allocation7 + $0x1d4] ss:$8 sps:$4 sm:$0xff]   ;;  %v339_v51 = vrot.slane %v3576_v31, %v338_v29  ;;  %v1885_v50 = vrot.slane %v1876_v48, %v334_v32 }
 0x173   :  { %2820 = vmatpush3.bf16.msra.mxu1 %v3317_v55 }
 0x174   :  { %2821 = vmatprep.subr.bf16.mxu1 %v3318_v56 }
 0x177   :  { %2822 = vmatpush3.bf16.msra.mxu1 %v3319_v59 }
 0x178   :  { %2823 = vmatprep.subr.bf16.mxu1 %v3320_v60 }
 0x17b   :  { %2824 = vmatpush3.bf16.msra.mxu1 %v3321_v63 }
 0x17c   :  { %2825 = vmatprep.subr.bf16.mxu1 %v3322_v0 }
 0x17f   :  { %2826 = vmatpush3.bf16.msra.mxu1 %v3323_v3 }
 0x180   :  { %2827 = vmatprep.subr.bf16.mxu1 %v3324_v4 }
 0x183   :  { %2828 = vmatpush3.bf16.msra.mxu1 %v3325_v7 }
 0x1c2   :  { %v1625_v53 = vpop.f32.mrb[0].mxu0 }
 0x1c3   :  { %v2840_v35 = vadd.f32 %v1625_v53, %v1503_v34  ;;  %v1627_v37 = vpop.f32.mrb[1].mxu0  ;;  %v343_v34 = vrot.slane %v3576_v31, %v342_v33  ;;  %v3328_v31 = vld [vmem:[#allocation8 + $0x78] sm:$0xff]  }
 0x1c4   :  { %v2842_v36 = vadd.f32 %v1627_v37, %v1505_v12  ;;  %v1629_v38 = vpop.f32.mrb[2].mxu0 }
 0x1c5   :  { %vm1796_vm0 = vcmp.gt.f32.partialorder %v2840_v35, 0.0  ;;  %v1800_v39 = vmul.f32 0.2, %v2840_v35  ;;  %v1630_v40 = vpop.f32.mrb[3].mxu0 }
 0x1c6   :  { %vm1797_vm1 = vcmp.gt.f32.partialorder %v2842_v36, 0.0  ;;  %v1801_v41 = vmul.f32 0.2, %v2842_v36 }
 0x1c7   :  { %v1804_v42 = vsel %vm1796_vm0, %v2840_v35, %v1800_v39 }
 0x1c8   :  { %v1805_v43 = vsel %vm1797_vm1, %v2842_v36, %v1801_v41  ;;  %v1808_v46 = vpack.c.bf16 %v1804_v42, %v1804_v42 }
 0x1c9   :  { %v1809_v44 = vpack.c.bf16 %v1805_v43, %v1805_v43 }
 0x1cb   :  { %2240 = vmatprep.mubr.bf16.mxu0 %v1809_v44 }
 0x1cc   :  { %2241 = vmatmul.mubr.bf16.vlgmr.msra.gmra.mrb[4].mxu0 %v1808_v46  ;;  %v3327_v46 = vld [vmem:[#allocation8 + $0x30] sm:$0xff]  }
 0x1cd   :  { %2250 = vmatpush1.bf16.msra.mxu0 %v3266_v45  ;;  %v3326_v45 = vld [vmem:[#allocation8 + $0x70] sm:$0xff]  }
 0x1ce   :  { %2251 = vmatprep.subr.bf16.mxu0 %v3271_v47  ;;  %2829 = vmatprep.subr.bf16.mxu1 %v3326_v45  ;;  %v3329_v47 = vld [vmem:[#allocation8 + $0x38] sm:$0xff]  }
 0x1cf   :  { %2830 = vmatpush3.bf16.msra.mxu1 %v3327_v46 }
 0x1d0   :  { %2831 = vmatprep.subr.bf16.mxu1 %v3328_v31 }
 0x1d1   :  { %2252 = vmatpush1.bf16.msra.mxu0 %v3269_v52 }
 0x1d2   :  { %2253 = vmatprep.subr.bf16.mxu0 %v3274_v54 }
 0x1d3   :  { %2832 = vmatpush3.bf16.msra.mxu1 %v3329_v47 }
 0x1d5   :  { %2254 = vmatpush1.bf16.msra.mxu0 %v3272_v57 }
 0x1d6   :  { %2255 = vmatprep.subr.bf16.mxu0 %v3277_v58 }
 0x1d9   :  { %2256 = vmatpush1.bf16.msra.mxu0 %v3275_v61 }
 0x1da   :  { %2257 = vmatprep.subr.bf16.mxu0 %v3280_v62 }
 0x1dd   :  { %2258 = vmatpush1.bf16.msra.mxu0 %v3278_v1 }
 0x1de   :  { %2259 = vmatprep.subr.bf16.mxu0 %v3283_v2 }
 0x1e1   :  { %2260 = vmatpush1.bf16.msra.mxu0 %v3281_v5 }
 0x1e2   :  { %2261 = vmatprep.subr.bf16.mxu0 %v3286_v6  ;;  %v2814_v6 = vld [vmem:[%s3612_s7] ss:$0 sm:$0xff] }
 0x1e5   :  { %2262 = vmatpush1.bf16.msra.mxu0 %v3284_v8 }
 0x1e6   :  { %2263 = vmatprep.subr.bf16.mxu0 %v3289_v10  ;;  %v2815_v10 = vld [vmem:[#allocation2] ss:$0 sm:$0xff] }
 0x1e9   :  { %2264 = vmatpush1.bf16.msra.mxu0 %v3287_v11 }
 0x1ea   :  { %2265 = vmatprep.subr.bf16.mxu0 %v3292_v13 }
 0x1ed   :  { %2266 = vmatpush1.bf16.msra.mxu0 %v3290_v14 }
 0x1ee   :  { %2267 = vmatprep.subr.bf16.mxu0 %v3295_v15 }
 0x1f1   :  { %2268 = vmatpush1.bf16.msra.mxu0 %v3293_v16 }
 0x1f2   :  { %2269 = vmatprep.subr.bf16.mxu0 %v3298_v17 }
 0x1f5   :  { %2270 = vmatpush1.bf16.msra.mxu0 %v3296_v19 }
 0x1f6   :  { %2271 = vmatprep.subr.bf16.mxu0 %v3301_v20 }
 0x1f9   :  { %2272 = vmatpush1.bf16.msra.mxu0 %v3299_v18 }
 0x1fa   :  { %2273 = vmatprep.subr.bf16.mxu0 %v3304_v21 }
 0x1fd   :  { %2274 = vmatpush1.bf16.msra.mxu0 %v3302_v22 }
 0x1fe   :  { %2275 = vmatprep.subr.bf16.mxu0 %v3307_v26 }
 0x201   :  { %2276 = vmatpush1.bf16.msra.mxu0 %v3305_v23 }
 0x202   :  { %2277 = vmatprep.subr.bf16.mxu0 %v3310_v24 }
 0x205   :  { %2278 = vmatpush1.bf16.msra.mxu0 %v3308_v25 }
 0x206   :  { %2279 = vmatprep.subr.bf16.mxu0 %v3313_v27 }
 0x209   :  { %2280 = vmatpush1.bf16.msra.mxu0 %v3311_v28 }
 0x241   :  { %v1789_v12 = vpop.f32.mrb[4].mxu1 }
 0x242   :  { %v2843_v53 = vadd.f32 %v1789_v12, %v339_v51  ;;  %v1791_v35 = vpop.f32.mrb[5].mxu1 }
 0x243   :  { %v2844_v37 = vadd.f32 %v1791_v35, %v343_v34  ;;  %v1793_v36 = vpop.f32.mrb[6].mxu1 }
 0x244   :  { %vm1798_vm2 = vcmp.gt.f32.partialorder %v2843_v53, 0.0  ;;  %v1802_v38 = vmul.f32 0.2, %v2843_v53  ;;  %v1794_v39 = vpop.f32.mrb[7].mxu1 }
 0x245   :  { %vm1799_vm3 = vcmp.gt.f32.partialorder %v2844_v37, 0.0  ;;  %v1803_v40 = vmul.f32 0.2, %v2844_v37 }
 0x246   :  { %v1806_v41 = vsel %vm1798_vm2, %v2843_v53, %v1802_v38 }
 0x247   :  { %v1807_v42 = vsel %vm1799_vm3, %v2844_v37, %v1803_v40  ;;  %v1810_v44 = vpack.c.bf16 %v1806_v41, %v1806_v41 }
 0x248   :  { %v1811_v43 = vpack.c.bf16 %v1807_v42, %v1807_v42 }
 0x24a   :  { %2281 = vmatprep.mubr.bf16.mxu0 %v1811_v43 }
 0x24b   :  { %2282 = vmatmul.mubr.bf16.vlgmr.msra.gmra.mrb[4].mxu0 %v1810_v44 }
 0x31e   :  { %v2283_v52 = vpop.f32.mrb[4].mxu0 }
 0x31f   :  { %v2845_v54 = vadd.f32 %v2283_v52, %v1881_v49  ;;  %v2285_v55 = vpop.f32.mrb[5].mxu0 }
 0x320   :  { %v2846_v56 = vadd.f32 %v2285_v55, %v1885_v50  ;;  %v2287_v57 = vpop.f32.mrb[6].mxu0 }
 0x321   :  { %vm2290_vm4 = vcmp.gt.f32.partialorder %v2845_v54, 0.0  ;;  %v2292_v58 = vmul.f32 0.2, %v2845_v54  ;;  %v2288_v59 = vpop.f32.mrb[7].mxu0 }
 0x322   :  { %vm2291_vm5 = vcmp.gt.f32.partialorder %v2846_v56, 0.0  ;;  %v2293_v60 = vmul.f32 0.2, %v2846_v56 }
 0x323   :  { %v2294_v61 = vsel %vm2290_vm4, %v2845_v54, %v2292_v58 }
 0x324   :  { %v2295_v62 = vsel %vm2291_vm5, %v2846_v56, %v2293_v60  ;;  %v2296_v0 = vpack.c.bf16 %v2294_v61, %v2294_v61 }
 0x325   :  { %v2297_v63 = vpack.c.bf16 %v2295_v62, %v2295_v62 }
 0x327   :  { %2465 = vmatprep.mubr.bf16.mxu1 %v2297_v63 }
 0x328   :  { %2466 = vmatmul.mubr.bf16.vlgmr.msra.gmra.mrb[8].mxu1 %v2296_v0 }
 0x3fb   :  { %v2833_v30 = vpop.f32.mrb[8].mxu1 }
 0x3fc   :  { %v2834_v32 = vpop.f32.mrb[9].mxu1 }
 0x3fd   :  { %v2835_v1 = vadd.f32 %v2834_v32, %v2833_v30  ;;  %v2836_v2 = vpop.f32.mrb[10].mxu1 }
 0x3fe   :  { %v2837_v3 = vpop.f32.mrb[11].mxu1 }
 0x3ff   :  { %v2468_v4 = vadd.f32 %v2835_v1, %v2797_v9 }
 0x401   :  { %vm2473_vm6 = vcmp.gt.f32.partialorder %v2468_v4, 0.0  ;;  %v2474_v5 = vmul.f32 0.2, %v2468_v4 }
 0x403   :  { %v2475_v7 = vsel %vm2473_vm6, %v2468_v4, %v2474_v5 }
 0x404   :  { %v2483_v8 = vmul.f32 %v2814_v6, %v2475_v7 }
 0x406   :  { %2484 = vadd.xlane.f32.xlu0 %v2483_v8 }
 0x493   :  { %v2485_v11 = vpop.xlane.xlu0 %2484 }
 0x494   :  { %v2493_v13 = vadd.f32 %v2815_v10, %v2485_v11 }
 0x496   :  { %v2816_v14 = vmul.f32 -1.442695, %v2493_v13 }
 0x498   :  { %3330 = vpow2.f32 %v2816_v14 }
 0x4a2   :  { %v3331_v15 = vpop.eup %3330 }
 0x4a3   :  { %v2497_v16 = vadd.f32 1.0, %v3331_v15 }
 0x4a5   :  { %3332 = vrcp.f32 %v2497_v16 }
 0x4af   :  { %v3333_v17 = vpop.eup %3332 }
 0x4b0   :  { %2501 = vst.msk [vmem:[%s3614_s9] sm:$0xff] %vm2500_vm7, %v3333_v17 }
 0x4b1   :  { %2506 = vsyncpa [#allocation4], 1 }
 0x4b2   :  { %2507 = vsyncpa [#allocation6], 1 }
 0x4b3   :  { %2508 = vsyncpa [#allocation9], 1 }

</bundles_post_ra>
